<compile_context>
chip_gen: v7x
topology: tpu7x:2x2x1
jax: 0.10.0
libtpu: 0.0.40
codegen_flags: <defaults>
</compile_context>

<pallas_src>
import numpy as np
import jax
import jax.numpy as jnp
from jax.experimental import pallas as pl
from jax.experimental.pallas import tpu as pltpu


# ------------------------------- kernel -------------------------------------

def gru_ode_cell_kernel(h_ref, w_rz_ref, b_rz_ref, w_hh_ref, b_hh_ref, dh_ref):
    h = h_ref[...]                       # (TB, H), f32 (or bf16) activations
    H = h.shape[-1]
    mm_dtype = w_rz_ref.dtype            # bf16 matmul operands, f32 accumulation

    # Fused r/z gates: one (TB, H) @ (H, 2H) MXU push.
    rz = jnp.dot(h.astype(mm_dtype), w_rz_ref[...],
                 preferred_element_type=jnp.float32) + b_rz_ref[...]

    # Only the r half is needed before the dependent u matmul (shorter EUP
    # critical path); z only feeds the final elementwise, compute it after.
    r = jax.nn.sigmoid(rz[:, :H])
    u = jnp.tanh(jnp.dot((r * h).astype(mm_dtype), w_hh_ref[...],
                         preferred_element_type=jnp.float32) + b_hh_ref[...])
    z = jax.nn.sigmoid(rz[:, H:])

    dh_ref[...] = ((1.0 - z) * (u - h)).astype(dh_ref.dtype)


# ------------------------------- wrapper ------------------------------------

def _pick_batch_tile(B):
    """Largest multiple-of-8 divisor of B (capped at 512 rows), preferring
    >= 2 grid steps so the "parallel" batch axis shards across v7x's 2 TCs."""
    if B % 8 != 0:
        # TODO(synk): pad B to a multiple of 8 on the host instead of one big tile.
        return B
    best = 8
    for t in range(8, min(B, 512) + 1, 8):
        if B % t == 0:
            best = t
    if B // best < 2:  # keep at least 2 grid steps when a smaller tile exists
        for t in range(best - 8, 7, -8):
            if B % t == 0 and B // t >= 2:
                best = t
                break
    return best


def gru_ode_cell(t, h, params, *, batch_tile=None):
    """dh = GRUODECell.forward(t, h).  `t` is unused, exactly as in the reference."""
    del t  # unused by the reference forward
    B, H = h.shape
    if batch_tile is None:
        batch_tile = _pick_batch_tile(B)
    assert B % batch_tile == 0
    grid = (B // batch_tile,)

    w_rz, b_rz = params["w_rz"], params["b_rz"]
    w_hh, b_hh = params["w_hh"], params["b_hh"]

    def nbytes(a):
        return a.size * a.dtype.itemsize

    weight_bytes = nbytes(w_rz) + nbytes(b_rz) + nbytes(w_hh) + nbytes(b_hh)
    # h + dh tiles double-buffered; rz/r/z/u/(r*h) f32 intermediates as headroom.
    act_bytes = 2 * 2 * batch_tile * H * h.dtype.itemsize
    scratch_bytes = 8 * batch_tile * H * 4
    vmem_limit = int(1.5 * (weight_bytes + act_bytes + scratch_bytes)) + (1 << 20)
    vmem_limit = min(max(vmem_limit, 32 << 20), 100 << 20)

    cost = pl.CostEstimate(
        flops=6 * B * H * H,                 # (B,H)@(H,2H) + (B,H)@(H,H)
        transcendentals=3 * B * H,           # sigmoid(r), sigmoid(z), tanh(u)
        bytes_accessed=2 * B * H * h.dtype.itemsize + weight_bytes,
    )

    def build(single_buffer_weights):
        res = dict(pipeline_mode=pl.Buffered(1)) if single_buffer_weights else {}
        in_specs = [
            pl.BlockSpec((batch_tile, H), lambda i: (i, 0)),      # h tile
            pl.BlockSpec((H, 2 * H), lambda i: (0, 0), **res),    # W_rz (resident)
            pl.BlockSpec((1, 2 * H), lambda i: (0, 0), **res),    # b_rz (resident)
            pl.BlockSpec((H, H), lambda i: (0, 0), **res),        # W_hh (resident)
            pl.BlockSpec((1, H), lambda i: (0, 0), **res),        # b_hh (resident)
        ]
        return pl.pallas_call(
            gru_ode_cell_kernel,
            out_shape=jax.ShapeDtypeStruct((B, H), h.dtype),
            grid_spec=pltpu.PrefetchScalarGridSpec(
                num_scalar_prefetch=0,
                grid=grid,
                in_specs=in_specs,
                out_specs=pl.BlockSpec((batch_tile, H), lambda i: (i, 0)),
            ),
            compiler_params=pltpu.CompilerParams(
                dimension_semantics=("parallel",),
                vmem_limit_bytes=vmem_limit,
            ),
            cost_estimate=cost,
        )

    try:
        return build(True)(h, w_rz, b_rz, w_hh, b_hh)
    except Exception:
        # Fallback for jax versions where per-BlockSpec buffer counts are not
        # supported in the top-level pallas_call pipeline.
        return build(False)(h, w_rz, b_rz, w_hh, b_hh)


# -------------------------- parameter initialization ------------------------

def init_params(key, hidden_size, *, matmul_dtype=jnp.bfloat16):
    """Matches init_weights: xavier_uniform_ on Linear weights, bias = 0.01.

    Weights are pre-transposed to (in, out), the r/z gate matrices fused into a
    single (H, 2H) block, and matmul operands stored in bf16 (accumulation on
    the MXU stays f32).  Biases stay f32.
    """
    H = hidden_size
    kr, kz, kh = jax.random.split(key, 3)
    bound = float(np.sqrt(6.0 / (H + H)))  # xavier_uniform for (H, H)
    w_hr = jax.random.uniform(kr, (H, H), jnp.float32, -bound, bound)  # (out, in)
    w_hz = jax.random.uniform(kz, (H, H), jnp.float32, -bound, bound)
    w_hh = jax.random.uniform(kh, (H, H), jnp.float32, -bound, bound)
    b = jnp.full((1, H), 0.01, jnp.float32)
    return {
        "w_rz": jnp.concatenate([w_hr.T, w_hz.T], axis=1).astype(matmul_dtype),  # (H, 2H)
        "b_rz": jnp.concatenate([b, b], axis=1),                                  # (1, 2H)
        "w_hh": w_hh.T.astype(matmul_dtype),                                      # (H, H)
        "b_hh": b,                                                                # (1, H)
    }


# ------------------------------ pure-JAX reference ---------------------------

def gru_ode_cell_ref(h, params):
    """Pure-JAX f32 reference of the original module's forward."""
    H = h.shape[-1]
    h = h.astype(jnp.float32)
    w_rz = params["w_rz"].astype(jnp.float32)
    w_hh = params["w_hh"].astype(jnp.float32)
    rz = jax.nn.sigmoid(h @ w_rz + params["b_rz"])
    r, z = rz[:, :H], rz[:, H:]
    u = jnp.tanh((r * h) @ w_hh + params["b_hh"])
    return (1.0 - z) * (u - h)


# ----------------------------------- main ------------------------------------

if __name__ == "__main__":
    B = 256          # batch: multiple of 8 -> default tiling = 2 x 128-row tiles
    H = 128          # hidden_size: multiple of 128 lanes

    key = jax.random.PRNGKey(0)
    kp, kh = jax.random.split(key, 2)

    params = init_params(kp, H)
    h = jax.random.normal(kh, (B, H), jnp.float32)
    t = jnp.float32(0.0)  # unused by the forward, kept for signature fidelity

    dh = gru_ode_cell(t, h, params)
    dh = jax.block_until_ready(dh)

    dh_ref = gru_ode_cell_ref(h, params)
    # bf16 matmul operands (f32 accumulation) vs. f32 reference -> relaxed tol.
    np.testing.assert_allclose(np.asarray(dh), np.asarray(dh_ref),
                               rtol=2e-2, atol=2e-2)
    assert np.all(np.isfinite(np.asarray(dh)))
    print("KERNEL_OK")
</pallas_src>

<mosaic_0001>
module attributes {stable_mosaic.version = 11 : i64} {
  func.func @gru_ode_cell_kernel(%arg0: i32, %arg1: memref<128x128xf32, #tpu.memory_space<vmem>>, %arg2: memref<128x256xbf16, #tpu.memory_space<vmem>>, %arg3: memref<1x256xf32, #tpu.memory_space<vmem>>, %arg4: memref<128x128xbf16, #tpu.memory_space<vmem>>, %arg5: memref<1x128xf32, #tpu.memory_space<vmem>>, %arg6: memref<128x128xf32, #tpu.memory_space<vmem>>) attributes {dimension_semantics = [#tpu.dimension_semantics<parallel>], iteration_bounds = array<i64: 2>, scalar_prefetch = 0 : i64, scratch_operands = 0 : i64, tpu.core_type = #tpu.core_type<tc>, window_params = [{transform_indices = @transform_0, window_bounds = array<i64: 128, 128>}, {pipeline_mode = #tpu.pipeline_mode<synchronous>, transform_indices = @transform_1, window_bounds = array<i64: 128, 256>}, {pipeline_mode = #tpu.pipeline_mode<synchronous>, transform_indices = @transform_2, window_bounds = array<i64: 1, 256>}, {pipeline_mode = #tpu.pipeline_mode<synchronous>, transform_indices = @transform_3, window_bounds = array<i64: 128, 128>}, {pipeline_mode = #tpu.pipeline_mode<synchronous>, transform_indices = @transform_4, window_bounds = array<i64: 1, 128>}, {transform_indices = @transform_5, window_bounds = array<i64: 128, 128>}]} {
    %c0 = arith.constant 0 : index
    %c0_0 = arith.constant 0 : index
    %0 = vector.load %arg1[%c0, %c0_0] : memref<128x128xf32, #tpu.memory_space<vmem>>, vector<128x128xf32>
    %1 = arith.truncf %0 : vector<128x128xf32> to vector<128x128xbf16>
    %c0_1 = arith.constant 0 : index
    %c0_2 = arith.constant 0 : index
    %2 = vector.load %arg2[%c0_1, %c0_2] : memref<128x256xbf16, #tpu.memory_space<vmem>>, vector<128x256xbf16>
    %cst = arith.constant dense<0.000000e+00> : vector<128x256xf32>
    %3 = tpu.matmul %1, %2, %cst {dimension_numbers = #tpu.dot_dimension_numbers<[1], [0], [0], [1], [0, 0, 1, 1], [], []>} : vector<128x128xbf16>, vector<128x256xbf16>, vector<128x256xf32> -> vector<128x256xf32>
    %c0_3 = arith.constant 0 : index
    %c0_4 = arith.constant 0 : index
    %4 = vector.load %arg3[%c0_3, %c0_4] : memref<1x256xf32, #tpu.memory_space<vmem>>, vector<1x256xf32>
    %5 = vector.broadcast %4 : vector<1x256xf32> to vector<128x256xf32>
    %6 = arith.addf %3, %5 : vector<128x256xf32>
    %7 = vector.extract_strided_slice %6 {offsets = [0, 0], sizes = [128, 128], strides = [1, 1]} : vector<128x256xf32> to vector<128x128xf32>
    %8 = arith.negf %7 : vector<128x128xf32>
    %9 = math.exp %8 : vector<128x128xf32>
    %cst_5 = arith.constant 1.000000e+00 : f32
    %10 = vector.broadcast %cst_5 : f32 to vector<128x128xf32>
    %11 = arith.addf %10, %9 : vector<128x128xf32>
    %12 = arith.divf %10, %11 : vector<128x128xf32>
    %13 = arith.mulf %12, %0 : vector<128x128xf32>
    %14 = arith.truncf %13 : vector<128x128xf32> to vector<128x128xbf16>
    %c0_6 = arith.constant 0 : index
    %c0_7 = arith.constant 0 : index
    %15 = vector.load %arg4[%c0_6, %c0_7] : memref<128x128xbf16, #tpu.memory_space<vmem>>, vector<128x128xbf16>
    %cst_8 = arith.constant dense<0.000000e+00> : vector<128x128xf32>
    %16 = tpu.matmul %14, %15, %cst_8 {dimension_numbers = #tpu.dot_dimension_numbers<[1], [0], [0], [1], [0, 0, 1, 1], [], []>} : vector<128x128xbf16>, vector<128x128xbf16>, vector<128x128xf32> -> vector<128x128xf32>
    %c0_9 = arith.constant 0 : index
    %c0_10 = arith.constant 0 : index
    %17 = vector.load %arg5[%c0_9, %c0_10] : memref<1x128xf32, #tpu.memory_space<vmem>>, vector<1x128xf32>
    %18 = vector.broadcast %17 : vector<1x128xf32> to vector<128x128xf32>
    %19 = arith.addf %16, %18 : vector<128x128xf32>
    %20 = math.tanh %19 : vector<128x128xf32>
    %21 = vector.extract_strided_slice %6 {offsets = [0, 128], sizes = [128, 128], strides = [1, 1]} : vector<128x256xf32> to vector<128x128xf32>
    %22 = arith.negf %21 : vector<128x128xf32>
    %23 = math.exp %22 : vector<128x128xf32>
    %cst_11 = arith.constant 1.000000e+00 : f32
    %24 = vector.broadcast %cst_11 : f32 to vector<128x128xf32>
    %25 = arith.addf %24, %23 : vector<128x128xf32>
    %26 = arith.divf %24, %25 : vector<128x128xf32>
    %cst_12 = arith.constant 1.000000e+00 : f32
    %27 = vector.broadcast %cst_12 : f32 to vector<128x128xf32>
    %28 = arith.subf %27, %26 : vector<128x128xf32>
    %29 = arith.subf %20, %0 : vector<128x128xf32>
    %30 = arith.mulf %28, %29 : vector<128x128xf32>
    %c0_13 = arith.constant 0 : index
    %c0_14 = arith.constant 0 : index
    %31 = vector.load %arg6[%c0_13, %c0_14] : memref<128x128xf32, #tpu.memory_space<vmem>>, vector<128x128xf32>
    tpu.vector_store %arg6[%c0_13, %c0_14], %30 {strides = array<i32>} : memref<128x128xf32, #tpu.memory_space<vmem>>, vector<128x128xf32>,
    return
  }
  func.func @transform_0(%arg0: i32) -> (i32, i32) {
    %c0_i32 = arith.constant 0 : i32
    %c0_i32_0 = arith.constant 0 : i32
    return %arg0, %c0_i32 : i32, i32
  }
  func.func @transform_1(%arg0: i32) -> (i32, i32) {
    %c0_i32 = arith.constant 0 : i32
    %c0_i32_0 = arith.constant 0 : i32
    %c0_i32_1 = arith.constant 0 : i32
    return %c0_i32, %c0_i32_0 : i32, i32
  }
  func.func @transform_2(%arg0: i32) -> (i32, i32) {
    %c0_i32 = arith.constant 0 : i32
    %c0_i32_0 = arith.constant 0 : i32
    %c0_i32_1 = arith.constant 0 : i32
    return %c0_i32, %c0_i32_0 : i32, i32
  }
  func.func @transform_3(%arg0: i32) -> (i32, i32) {
    %c0_i32 = arith.constant 0 : i32
    %c0_i32_0 = arith.constant 0 : i32
    %c0_i32_1 = arith.constant 0 : i32
    return %c0_i32, %c0_i32_0 : i32, i32
  }
  func.func @transform_4(%arg0: i32) -> (i32, i32) {
    %c0_i32 = arith.constant 0 : i32
    %c0_i32_0 = arith.constant 0 : i32
    %c0_i32_1 = arith.constant 0 : i32
    return %c0_i32, %c0_i32_0 : i32, i32
  }
  func.func @transform_5(%arg0: i32) -> (i32, i32) {
    %c0_i32 = arith.constant 0 : i32
    %c0_i32_0 = arith.constant 0 : i32
    return %arg0, %c0_i32 : i32, i32
  }
}

module attributes {stable_mosaic.version = 11 : i64} {
  func.func @gru_ode_cell_kernel(%arg0: i32, %arg1: memref<128x128xf32, #tpu.memory_space<vmem>>, %arg2: memref<128x256xbf16, #tpu.memory_space<vmem>>, %arg3: memref<1x256xf32, #tpu.memory_space<vmem>>, %arg4: memref<128x128xbf16, #tpu.memory_space<vmem>>, %arg5: memref<1x128xf32, #tpu.memory_space<vmem>>, %arg6: memref<128x128xf32, #tpu.memory_space<vmem>>) attributes {dimension_semantics = [#tpu.dimension_semantics<parallel>], iteration_bounds = array<i64: 2>, scalar_prefetch = 0 : i64, scratch_operands = 0 : i64, tpu.core_type = #tpu.core_type<tc>, window_params = [{transform_indices = @transform_0, window_bounds = array<i64: 128, 128>}, {pipeline_mode = #tpu.pipeline_mode<synchronous>, transform_indices = @transform_1, window_bounds = array<i64: 128, 256>}, {pipeline_mode = #tpu.pipeline_mode<synchronous>, transform_indices = @transform_2, window_bounds = array<i64: 1, 256>}, {pipeline_mode = #tpu.pipeline_mode<synchronous>, transform_indices = @transform_3, window_bounds = array<i64: 128, 128>}, {pipeline_mode = #tpu.pipeline_mode<synchronous>, transform_indices = @transform_4, window_bounds = array<i64: 1, 128>}, {transform_indices = @transform_5, window_bounds = array<i64: 128, 128>}]} {
    %c0 = arith.constant 0 : index
    %c0_0 = arith.constant 0 : index
    %0 = vector.load %arg1[%c0, %c0_0] : memref<128x128xf32, #tpu.memory_space<vmem>>, vector<128x128xf32>
    %1 = arith.truncf %0 : vector<128x128xf32> to vector<128x128xbf16>
    %c0_1 = arith.constant 0 : index
    %c0_2 = arith.constant 0 : index
    %2 = vector.load %arg2[%c0_1, %c0_2] : memref<128x256xbf16, #tpu.memory_space<vmem>>, vector<128x256xbf16>
    %cst = arith.constant dense<0.000000e+00> : vector<128x256xf32>
    %3 = tpu.matmul %1, %2, %cst {dimension_numbers = #tpu.dot_dimension_numbers<[1], [0], [0], [1], [0, 0, 1, 1], [], []>} : vector<128x128xbf16>, vector<128x256xbf16>, vector<128x256xf32> -> vector<128x256xf32>
    %c0_3 = arith.constant 0 : index
    %c0_4 = arith.constant 0 : index
    %4 = vector.load %arg3[%c0_3, %c0_4] : memref<1x256xf32, #tpu.memory_space<vmem>>, vector<1x256xf32>
    %5 = vector.broadcast %4 : vector<1x256xf32> to vector<128x256xf32>
    %6 = arith.addf %3, %5 : vector<128x256xf32>
    %7 = vector.extract_strided_slice %6 {offsets = [0, 0], sizes = [128, 128], strides = [1, 1]} : vector<128x256xf32> to vector<128x128xf32>
    %8 = arith.negf %7 : vector<128x128xf32>
    %9 = math.exp %8 : vector<128x128xf32>
    %cst_5 = arith.constant 1.000000e+00 : f32
    %10 = vector.broadcast %cst_5 : f32 to vector<128x128xf32>
    %11 = arith.addf %10, %9 : vector<128x128xf32>
    %12 = arith.divf %10, %11 : vector<128x128xf32>
    %13 = arith.mulf %12, %0 : vector<128x128xf32>
    %14 = arith.truncf %13 : vector<128x128xf32> to vector<128x128xbf16>
    %c0_6 = arith.constant 0 : index
    %c0_7 = arith.constant 0 : index
    %15 = vector.load %arg4[%c0_6, %c0_7] : memref<128x128xbf16, #tpu.memory_space<vmem>>, vector<128x128xbf16>
    %cst_8 = arith.constant dense<0.000000e+00> : vector<128x128xf32>
    %16 = tpu.matmul %14, %15, %cst_8 {dimension_numbers = #tpu.dot_dimension_numbers<[1], [0], [0], [1], [0, 0, 1, 1], [], []>} : vector<128x128xbf16>, vector<128x128xbf16>, vector<128x128xf32> -> vector<128x128xf32>
    %c0_9 = arith.constant 0 : index
    %c0_10 = arith.constant 0 : index
    %17 = vector.load %arg5[%c0_9, %c0_10] : memref<1x128xf32, #tpu.memory_space<vmem>>, vector<1x128xf32>
    %18 = vector.broadcast %17 : vector<1x128xf32> to vector<128x128xf32>
    %19 = arith.addf %16, %18 : vector<128x128xf32>
    %20 = math.tanh %19 : vector<128x128xf32>
    %21 = vector.extract_strided_slice %6 {offsets = [0, 128], sizes = [128, 128], strides = [1, 1]} : vector<128x256xf32> to vector<128x128xf32>
    %22 = arith.negf %21 : vector<128x128xf32>
    %23 = math.exp %22 : vector<128x128xf32>
    %cst_11 = arith.constant 1.000000e+00 : f32
    %24 = vector.broadcast %cst_11 : f32 to vector<128x128xf32>
    %25 = arith.addf %24, %23 : vector<128x128xf32>
    %26 = arith.divf %24, %25 : vector<128x128xf32>
    %cst_12 = arith.constant 1.000000e+00 : f32
    %27 = vector.broadcast %cst_12 : f32 to vector<128x128xf32>
    %28 = arith.subf %27, %26 : vector<128x128xf32>
    %29 = arith.subf %20, %0 : vector<128x128xf32>
    %30 = arith.mulf %28, %29 : vector<128x128xf32>
    %c0_13 = arith.constant 0 : index
    %c0_14 = arith.constant 0 : index
    %31 = vector.load %arg6[%c0_13, %c0_14] : memref<128x128xf32, #tpu.memory_space<vmem>>, vector<128x128xf32>
    tpu.vector_store %arg6[%c0_13, %c0_14], %30 {strides = array<i32>} : memref<128x128xf32, #tpu.memory_space<vmem>>, vector<128x128xf32>,
    return
  }
  func.func @transform_0(%arg0: i32) -> (i32, i32) {
    %c0_i32 = arith.constant 0 : i32
    %c0_i32_0 = arith.constant 0 : i32
    return %arg0, %c0_i32 : i32, i32
  }
  func.func @transform_1(%arg0: i32) -> (i32, i32) {
    %c0_i32 = arith.constant 0 : i32
    %c0_i32_0 = arith.constant 0 : i32
    %c0_i32_1 = arith.constant 0 : i32
    return %c0_i32, %c0_i32_0 : i32, i32
  }
  func.func @transform_2(%arg0: i32) -> (i32, i32) {
    %c0_i32 = arith.constant 0 : i32
    %c0_i32_0 = arith.constant 0 : i32
    %c0_i32_1 = arith.constant 0 : i32
    return %c0_i32, %c0_i32_0 : i32, i32
  }
  func.func @transform_3(%arg0: i32) -> (i32, i32) {
    %c0_i32 = arith.constant 0 : i32
    %c0_i32_0 = arith.constant 0 : i32
    %c0_i32_1 = arith.constant 0 : i32
    return %c0_i32, %c0_i32_0 : i32, i32
  }
  func.func @transform_4(%arg0: i32) -> (i32, i32) {
    %c0_i32 = arith.constant 0 : i32
    %c0_i32_0 = arith.constant 0 : i32
    %c0_i32_1 = arith.constant 0 : i32
    return %c0_i32, %c0_i32_0 : i32, i32
  }
  func.func @transform_5(%arg0: i32) -> (i32, i32) {
    %c0_i32 = arith.constant 0 : i32
    %c0_i32_0 = arith.constant 0 : i32
    return %arg0, %c0_i32 : i32, i32
  }
}

</mosaic_0001>

<bundles_post_ra>
// kernel: tpu_custom_call.1
= control target key start
LH: loop header
LB: loop body
LE: loop exit
PB: predicated region body
PF: predicated region fallthrough
CT: control target
= control target key end

     0   :  { %10 = vsyncpa [#allocation3], 0  ;;  %s2165_s0 = inlined_call_operand.hbm [shape: f32[256,128], index: 0, kind: input, shape index: {}]   ;;  %s2166_s1 = inlined_call_operand.hbm [shape: bf16[128,256], index: 1, kind: input, shape index: {}]   ;;  %s2167_s2 = inlined_call_operand.vmem [shape: f32[1,256], index: 2, kind: input, shape index: {}]   ;;  %s2168_s3 = inlined_call_operand.hbm [shape: bf16[128,128], index: 3, kind: input, shape index: {}]   ;;  %s2169_s4 = inlined_call_operand.vmem [shape: f32[1,128], index: 4, kind: input, shape index: {}]   ;;  %s2170_s5 = inlined_call_operand.hbm [shape: f32[256,128], index: 5, kind: output, shape index: {}]  }
   0x1   :  { %12 = vsyncpa [#allocation3 + $0x1], 0 }
   0x2   :  { %13 = vsyncpa [#allocation6], 0 }
   0x3   :  { %14 = vsyncpa [#allocation4], 0 }
   0x4   :  { %16 = vsyncpa [#allocation4 + $0x1], 0  ;;  %s1680_s18 = smov 0   ;;  %s1682_s19 = smov 0  }
   0x5   :  { %s1684_s20 = smov 0   ;;  %s1686_s21 = smov 0  }
   0x6 LB: > { %s1701_s22 = sadd.s32 4294967295, %s1637_s21   ;;  %s1090_s23 = sadd.s32 4294967294, %s1637_s21   ;;  %s1637_s21 = sphi %s1686_s21, %s2190_s21   ;;  %s1633_s20 = sphi %s1684_s20, %s2189_s20   ;;  %s1629_s19 = sphi %s1682_s19, %s2188_s19   ;;  %s1625_s18 = sphi %s1680_s18, %s2187_s18  }
   0x7   : > { %p42_p0 = scmp.ne.s32.totalorder %s1629_s19, %s1625_s18  ;;  %p2171_p1 = scmp.eq.s32.totalorder %s1701_s22, 0 }
   0x8   : > { %p156_p3 = scmp.eq.s32.totalorder %s1090_s23, 1  ;;  %p1091_p5 = scmp.ge.s32.totalorder %s1637_s21, 1 }
   0x9   : > { %p1710_p4 = por %p2171_p1, %p42_p0  ;;  %p163_p7 = scmp.lt.s32.totalorder %s1637_s21, 3 }
   0xa   : > { %p1715_p6 = por %p156_p3, %p42_p0  ;;  %s1639_s27 = smov [#allocation5]  }
   0xb   : > { %s2174_s24 = scalar_select %p1710_p4, 1, 0 }
   0xc   : > { %s2175_s25 = scalar_select %p1715_p6, 1, 0 }
   0xd   : > { %p1720_p8 = pnand %p1091_p5, %p163_p7  ;;  %s175_s28 = sshll.u32 %s1639_s27, 4  ;;  %s1724_s28 = int_to_ptr.vmem [resolvable:$true] %s175_s28 }
   0xe   : > { %s1640_s30 = smov [#allocation7]   ;;  %s1481_s9 = scalar_lea.hbm %s2166_s1, 2048 }
   0xf   : > { %p1227_p9 = pneg %p1720_p8  ;;  %s191_s6 = sshll.u32 %s1640_s30, 4  ;;  %s1735_s6 = int_to_ptr.vmem [resolvable:$true] %s191_s6 }
  0x10   : > { %p1482_p12 = scmp.ne.s32.totalorder %s2166_s1, %s1481_s9  ;;  %p1488_p5 = scmp.lt.u32.totalorder %s1481_s9, %s2166_s1 }
  0x11   : > { %p1731_p11 = pnand %p1227_p9, %p2171_p1 }
  0x13   : > { %p1483_p13 = pneg %p1731_p11 }
  0x15   : > { %p1484_p0 = pnand %p1483_p13, %p1482_p12 }
  0x17   : > { %p1485_p3 = pneg %p1484_p0 }
  0x19   : > { %p1490_p7 = pnand %p1488_p5, %p1485_p3 }
  0x1b   : > { %1493 = shalt.err (!%p1490_p7)
}
  0x1c   : > { %s1494_s14 = scalar_lea.vmem %s1724_s28, 2048  ;;  %p1502_p2 = scmp.lt.s32.totalorder %s1724_s28, %s1724_s28 }
  0x1d   : > { %p1495_p9 = scmp.ne.s32.totalorder %s1724_s28, %s1494_s14  ;;  %p1503_p12 = scmp.lt.s32.totalorder %s1494_s14, %s1494_s14 }
  0x1f   : > { %p1497_p10 = pnand %p1495_p9, %p1483_p13  ;;  %p1504_p0 = por %p1503_p12, %p1502_p2 }
  0x21   : > { %p1498_p1 = pneg %p1497_p10 }
  0x23   : > { %p1505_p6 = pnand %p1504_p0, %p1498_p1 }
  0x25   : > { %1508 = shalt.err (!%p1505_p6)
}
  0x26   : > { %s1641_s15 = smov 128   ;;  %s1642_s16 = smov 8  }
  0x27   : > { %1230 = dma.hbm_to_vmem [thread:$0]  (!%p1731_p11), %s2166_s1, 2048, %s1724_s28, [#allocation6], %s1641_s15, %s1641_s15, %s1642_s16  }
  0x28   : > { %s1509_s7 = scalar_lea.hbm %s2168_s3, 1024 }
  0x29   : > { %p1510_p1 = scmp.ne.s32.totalorder %s2168_s3, %s1509_s7  ;;  %p1516_p10 = scmp.lt.u32.totalorder %s1509_s7, %s2168_s3 }
  0x2b   : > { %p1512_p2 = pnand %p1510_p1, %p1483_p13 }
  0x2d   : > { %p1513_p6 = pneg %p1512_p2 }
  0x2f   : > { %p1518_p3 = pnand %p1516_p10, %p1513_p6 }
  0x31   : > { %1521 = shalt.err (!%p1518_p3)
}
  0x32   : > { %s1522_s28 = scalar_lea.vmem %s1735_s6, 1024  ;;  %p1530_p12 = scmp.lt.s32.totalorder %s1735_s6, %s1735_s6 }
  0x33   : > { %p1523_p5 = scmp.ne.s32.totalorder %s1735_s6, %s1522_s28  ;;  %p1531_p0 = scmp.lt.s32.totalorder %s1522_s28, %s1522_s28 }
  0x35   : > { %p1525_p7 = pnand %p1523_p5, %p1483_p13  ;;  %p1532_p1 = por %p1531_p0, %p1530_p12 }
  0x37   : > { %p1526_p9 = pneg %p1525_p7 }
  0x39   : > { %p1533_p2 = pnand %p1532_p1, %p1526_p9 }
  0x3b   : > { %1536 = shalt.err (!%p1533_p2)
}
  0x3c   : > { %s1643_s12 = smov 64   ;;  %s1644_s13 = smov 4  }
  0x3d   : > { %1233 = dma.hbm_to_vmem [thread:$0]  (!%p1731_p11), %s2168_s3, 1024, %s1735_s6, [#allocation6], %s1643_s12, %s1643_s12, %s1644_s13  }
  0x3e   : > { %s1793_s23 = sadd.s32 1, %s1637_s21   ;;  %s29_s30 = sadd.s32 1, %s1633_s20 }
  0x3f   : > { %s26_s27 = ssub.s32 %s1637_s21, %s1793_s23  ;;  %p36_p6 = scmp.ne.s32.totalorder %s1633_s20, %s1629_s19 }
  0x40   : > { %p27_p13 = scmp.eq.s32.totalorder %s26_s27, 0  ;;  %p37_p10 = scmp.eq.s32.totalorder %s1637_s21, 0 }
  0x41   : > { %p2178_p5 = scmp.eq.s32.totalorder %s1701_s22, 1  ;;  %p1244_p9 = scmp.lt.s32.totalorder %s1637_s21, 2 }
  0x42   : > { %s1802_s7 = scalar_select %p27_p13, %s1633_s20, %s29_s30  }
  0x43   : > { %p38_p3 = por %p37_p10, %p36_p6  ;;  %p1806_p7 = por %p2178_p5, %p36_p6 }
  0x44   : > { %s208_s29 = sand.u32 1, %s1633_s20   ;;  %s1165_s6 = sshll.u32 %s1637_s21, 11 }
  0x45   : > { %s2179_s8 = scalar_select %p1806_p7, 1, 0 }
  0x46   : > { %s1095_s9 = sshll.u32 %s208_s29, 7  ;;  %s1816_s28 = scalar_lea.hbm %s2165_s0, %s1165_s6 }
  0x47   : > { %s212_s12 = scalar_lea.vmem [#allocation2], %s1095_s9  ;;  %p1820_p11 = pnand %p1244_p9, %p38_p3 }
  0x48   : > { %s219_s13 = sshll.u32 %s212_s12, 4  ;;  %s1824_s17 = scalar_lea.sflag [#allocation3], %s208_s29  ;;  %s1818_s13 = int_to_ptr.vmem [resolvable:$true] %s219_s13 }
  0x49   : > { %s1537_s27 = scalar_lea.hbm %s1816_s28, 2048  ;;  %p1539_p0 = pneg %p1820_p11 }
  0x4a   : > { %p1538_p12 = scmp.ne.s32.totalorder %s1816_s28, %s1537_s27  ;;  %s1542_s6 = scalar_lea.hbm %s2165_s0, 4096 }
  0x4b   : > { %p1543_p13 = scmp.lt.u32.totalorder %s1816_s28, %s2165_s0  ;;  %p1544_p6 = scmp.lt.u32.totalorder %s1542_s6, %s1537_s27 }
  0x4c   : > { %p1540_p1 = pnand %p1539_p0, %p1538_p12  ;;  %p1546_p3 = scmp.lt.u32.totalorder %s1537_s27, %s1816_s28 }
  0x4d   : > { %p1545_p10 = por %p1544_p6, %p1543_p13 }
  0x4e   : > { %p1541_p2 = pneg %p1540_p1 }
  0x4f   : > { %p1547_p5 = por %p1546_p3, %p1545_p10 }
  0x51   : > { %p1548_p9 = pnand %p1547_p5, %p1541_p2 }
  0x53   : > { %1551 = shalt.err (!%p1548_p9)
}
  0x54   : > { %s1552_s29 = scalar_lea.vmem %s1818_s13, 2048  ;;  %s1645_s12 = smov [#allocation2]  }
  0x55   : > { %p1553_p12 = scmp.ne.s32.totalorder %s1818_s13, %s1552_s29  ;;  %s1557_s30 = sshll.u32 %s1645_s12, 4  ;;  %s1558_s30 = int_to_ptr.vmem [resolvable:$false] %s1557_s30 }
  0x56   : > { %s1559_s9 = scalar_lea.vmem %s1558_s30, 4096  ;;  %p1560_p4 = scmp.lt.s32.totalorder %s1818_s13, %s1558_s30 }
  0x57   : > { %p1555_p1 = pnand %p1553_p12, %p1539_p0  ;;  %p1561_p13 = scmp.lt.s32.totalorder %s1559_s9, %s1552_s29 }
  0x59   : > { %p1556_p7 = pneg %p1555_p1  ;;  %p1562_p6 = por %p1561_p13, %p1560_p4 }
  0x5b   : > { %p1563_p10 = pnand %p1562_p6, %p1556_p7 }
  0x5d   : > { %1566 = shalt.err (!%p1563_p10)
}
  0x5e   : > { %1237 = dma.hbm_to_vmem [thread:$0]  (!%p1820_p11), %s1816_s28, 2048, %s1818_s13, %s1824_s17, %s1641_s15, %s1641_s15, %s1642_s16  }
  0x5f   : > { %231 = sbr.rel (%p1720_p8) target bundleno = 688 (0x2b0), region = 40  ;;  %s1858_s27 = sand.u32 (!%p1720_p8), 1, %s1629_s19  }
  0x60   : > { %s1099_s6 = sshll.u32 (!%p1720_p8), %s1858_s27, 7  ;;  %s234_s10 = scalar_lea.sflag (!%p1720_p8), [#allocation3], %s1858_s27 }
  0x61   : > { %s1864_s14 = scalar_lea.vmem (!%p1720_p8), [#allocation2], %s1099_s6  ;;  %p2181_p4 = scmp.ne.s32.totalorder (!%p1720_p8), %s2174_s24, 0 }
  0x66   : > { %1612 = dma.done.wait (%p2181_p4), %s234_s10, 2048  }
  0x67   : > { %1614 = vsyncadd (%p2181_p4), %s234_s10, 4294965248  ;;  %p2182_p7 = scmp.eq.s32.totalorder %s1701_s22, 0 }
  0x69   : > { %1616 = dma.done.wait (%p2182_p7), [#allocation6], 3072   ;;  %p2183_p8 = pmov %p2182_p7 }
  0x6a   : > { %v1646_v0 = vmov 0   ;;  %v1289_v1 = vld [vmem:[#allocation5 + $0x4] ss:$8 sps:$4 sm:$0xff]   ;;  %v1291_v2 = vld [vmem:[#allocation5] ss:$8 sps:$4 sm:$0xff]   ;;  %v1885_v20 = vld [vmem:[%s1864_s14 + $0x10] sm:$0xff]  ;;  %v317_v49 = vlaneseq }
  0x6b   : > { %1618 = vsyncadd (%p2183_p8), [#allocation6], 4294964224  ;;  %439 = vmatprep.mubr.bf16.mxu0 %v1646_v0  ;;  %407 = vmatprep.subr.bf16.mxu0 %v1289_v1  ;;  %v1292_v3 = vld [vmem:[#allocation5 + $0x14] ss:$8 sps:$4 sm:$0xff]   ;;  %v1294_v4 = vld [vmem:[#allocation5 + $0x10] ss:$8 sps:$4 sm:$0xff]  }
  0x6c   : > { %408 = vmatpush1.bf16.msra.mxu0 %v1291_v2  ;;  %v1295_v5 = vld [vmem:[#allocation5 + $0x24] ss:$8 sps:$4 sm:$0xff]   ;;  %v1297_v6 = vld [vmem:[#allocation5 + $0x20] ss:$8 sps:$4 sm:$0xff]   ;;  %v1298_v7 = vld [vmem:[#allocation5 + $0x34] ss:$8 sps:$4 sm:$0xff]  }
  0x6d   : > { %409 = vmatprep.subr.bf16.mxu0 %v1292_v3  ;;  %v1300_v8 = vld [vmem:[#allocation5 + $0x30] ss:$8 sps:$4 sm:$0xff]   ;;  %v1301_v9 = vld [vmem:[#allocation5 + $0x44] ss:$8 sps:$4 sm:$0xff]   ;;  %v1303_v10 = vld [vmem:[#allocation5 + $0x40] ss:$8 sps:$4 sm:$0xff]  }
  0x6e   : > { %v1304_v11 = vld [vmem:[#allocation5 + $0x54] ss:$8 sps:$4 sm:$0xff]   ;;  %v1306_v12 = vld [vmem:[#allocation5 + $0x50] ss:$8 sps:$4 sm:$0xff]   ;;  %v1307_v13 = vld [vmem:[#allocation5 + $0x64] ss:$8 sps:$4 sm:$0xff]  }
  0x6f   : > { %v1309_v14 = vld [vmem:[#allocation5 + $0x60] ss:$8 sps:$4 sm:$0xff]   ;;  %v1310_v15 = vld [vmem:[#allocation5 + $0x74] ss:$8 sps:$4 sm:$0xff]   ;;  %v1312_v16 = vld [vmem:[#allocation5 + $0x70] ss:$8 sps:$4 sm:$0xff]  }
  0x70   : > { %410 = vmatpush1.bf16.msra.mxu0 %v1294_v4  ;;  %v1876_v17 = vld [vmem:[%s1864_s14] sm:$0xff]  ;;  %v1879_v18 = vld [vmem:[%s1864_s14 + $0x8] sm:$0xff]  ;;  %v1888_v21 = vld [vmem:[%s1864_s14 + $0x18] sm:$0xff]  ;;  %v1946_v50 = vshrl.u32 %v317_v49, 7  ;;  %s2064_s28 = scalar_lea.vmem [#allocation8], %s1099_s6  ;;  %s1166_s13 = sshll.u32 %s1701_s22, 11 }
  0x71   : > { %411 = vmatprep.subr.bf16.mxu0 %v1295_v5  ;;  %v291_v19 = vpack.c.bf16 %v1879_v18, %v1876_v17  ;;  %v292_v22 = vpack.c.bf16 %v1888_v21, %v1885_v20  ;;  %v1894_v23 = vld [vmem:[%s1864_s14 + $0x20] sm:$0xff]  ;;  %v1897_v24 = vld [vmem:[%s1864_s14 + $0x28] sm:$0xff]  ;;  %v1903_v26 = vld [vmem:[%s1864_s14 + $0x30] sm:$0xff]  ;;  %s998_s17 = sshll.u32 %s2064_s28, 4  ;;  %s2116_s12 = scalar_lea.hbm %s2170_s5, %s1166_s13  ;;  %s2118_s17 = int_to_ptr.vmem [resolvable:$true] %s998_s17 }
  0x72   : > { %v293_v25 = vpack.c.bf16 %v1897_v24, %v1894_v23  ;;  %v1906_v27 = vld [vmem:[%s1864_s14 + $0x38] sm:$0xff]  ;;  %v1912_v29 = vld [vmem:[%s1864_s14 + $0x40] sm:$0xff]  ;;  %v1915_v30 = vld [vmem:[%s1864_s14 + $0x48] sm:$0xff]  ;;  %v319_v51 = vsub.s32 0, %v1946_v50  ;;  %s985_s22 = scalar_lea.sflag [#allocation4], %s1858_s27  ;;  %s1567_s30 = scalar_lea.vmem %s2118_s17, 2048 }
  0x73   : > { %v294_v28 = vpack.c.bf16 %v1906_v27, %v1903_v26  ;;  %v295_v31 = vpack.c.bf16 %v1915_v30, %v1912_v29  ;;  %v1921_v32 = vld [vmem:[%s1864_s14 + $0x50] sm:$0xff]  ;;  %v1924_v33 = vld [vmem:[%s1864_s14 + $0x58] sm:$0xff]  ;;  %v1930_v35 = vld [vmem:[%s1864_s14 + $0x60] sm:$0xff]  ;;  %p1568_p11 = scmp.ne.s32.totalorder %s2118_s17, %s1567_s30  ;;  %p2184_p0 = scmp.ne.s32.totalorder %s2179_s8, 0 }
  0x74   : > { %412 = vmatpush1.bf16.msra.mxu0 %v1297_v6  ;;  %v296_v34 = vpack.c.bf16 %v1924_v33, %v1921_v32  ;;  %v1933_v36 = vld [vmem:[%s1864_s14 + $0x68] sm:$0xff]  ;;  %v1939_v38 = vld [vmem:[%s1864_s14 + $0x70] sm:$0xff]  ;;  %v1942_v39 = vld [vmem:[%s1864_s14 + $0x78] sm:$0xff]  ;;  %s1647_s9 = smov [#allocation8]  }
  0x75   : > { %413 = vmatprep.subr.bf16.mxu0 %v1298_v7  ;;  %v297_v37 = vpack.c.bf16 %v1933_v36, %v1930_v35  ;;  %v298_v40 = vpack.c.bf16 %v1942_v39, %v1939_v38  ;;  %v1313_v41 = vld [vmem:[#allocation7] sm:$0xff]   ;;  %v1314_v42 = vld [vmem:[#allocation7 + $0x8] sm:$0xff]   ;;  %v1315_v43 = vld [vmem:[#allocation7 + $0x10] sm:$0xff]   ;;  %p1569_p2 = pnand %p1568_p11, %p2184_p0  ;;  %s1571_s6 = sshll.u32 %s1647_s9, 4  ;;  %s1572_s6 = int_to_ptr.vmem [resolvable:$false] %s1571_s6 }
  0x76   : > { %1183 = vmatprep.subr.bf16.mxu1 %v1313_v41  ;;  %v1316_v44 = vld [vmem:[#allocation7 + $0x18] sm:$0xff]   ;;  %v1317_v45 = vld [vmem:[#allocation7 + $0x20] sm:$0xff]   ;;  %v1318_v46 = vld [vmem:[#allocation7 + $0x28] sm:$0xff]   ;;  %s1573_s10 = scalar_lea.vmem %s1572_s6, 4096  ;;  %p1574_p5 = scmp.lt.s32.totalorder %s2118_s17, %s1572_s6 }
  0x77   : > { %1184 = vmatpush3.bf16.msra.mxu1 %v1313_v41  ;;  %v1319_v47 = vld [vmem:[#allocation7 + $0x30] sm:$0xff]   ;;  %v1320_v48 = vld [vmem:[#allocation7 + $0x38] sm:$0xff]   ;;  %v1952_v52 = vld [vmem:[%s2167_s2] sm:$0x3]  ;;  %p1570_p3 = pneg %p1569_p2  ;;  %p1575_p9 = scmp.lt.s32.totalorder %s1573_s10, %s1567_s30 }
  0x78   : > { %414 = vmatpush1.bf16.msra.mxu0 %v1300_v8  ;;  %1185 = vmatprep.subr.bf16.mxu1 %v1314_v42  ;;  %v1955_v53 = vrot.slane %v1952_v52, %v319_v51 }
  0x79   : > { %415 = vmatprep.subr.bf16.mxu0 %v1301_v9  ;;  %p1576_p12 = por %p1575_p9, %p1574_p5 }
  0x7b   : > { %1186 = vmatpush3.bf16.msra.mxu1 %v1314_v42  ;;  %p1577_p1 = pnand %p1576_p12, %p1570_p3 }
  0x7c   : > { %416 = vmatpush1.bf16.msra.mxu0 %v1303_v10  ;;  %1187 = vmatprep.subr.bf16.mxu1 %v1315_v43 }
  0x7d   : > { %417 = vmatprep.subr.bf16.mxu0 %v1304_v11 }
  0x7f   : > { %1188 = vmatpush3.bf16.msra.mxu1 %v1315_v43 }
  0x80   : > { %418 = vmatpush1.bf16.msra.mxu0 %v1306_v12  ;;  %1189 = vmatprep.subr.bf16.mxu1 %v1316_v44 }
  0x81   : > { %419 = vmatprep.subr.bf16.mxu0 %v1307_v13 }
  0x83   : > { %1190 = vmatpush3.bf16.msra.mxu1 %v1316_v44 }
  0x84   : > { %420 = vmatpush1.bf16.msra.mxu0 %v1309_v14  ;;  %1191 = vmatprep.subr.bf16.mxu1 %v1317_v45 }
  0x85   : > { %421 = vmatprep.subr.bf16.mxu0 %v1310_v15 }
  0x87   : > { %1192 = vmatpush3.bf16.msra.mxu1 %v1317_v45 }
  0x88   : > { %422 = vmatpush1.bf16.msra.mxu0 %v1312_v16  ;;  %1193 = vmatprep.subr.bf16.mxu1 %v1318_v46 }
  0x8b   : > { %440 = vmatmul.mubr.bf16.vlgmr.msra.gmra.mrb[0].mxu0 %v291_v19  ;;  %1194 = vmatpush3.bf16.msra.mxu1 %v1318_v46 }
  0x8c   : > { %449 = vmatprep.mubr.bf16.mxu0 %v1646_v0  ;;  %1195 = vmatprep.subr.bf16.mxu1 %v1319_v47 }
  0x8f   : > { %1196 = vmatpush3.bf16.msra.mxu1 %v1319_v47 }
  0x90   : > { %1197 = vmatprep.subr.bf16.mxu1 %v1320_v48 }
  0x93   : > { %450 = vmatmul.mubr.bf16.gmra.mrb[4].mxu0 %v292_v22  ;;  %1198 = vmatpush3.bf16.msra.mxu1 %v1320_v48 }
  0x94   : > { %459 = vmatprep.mubr.bf16.mxu0 %v1646_v0 }
  0x9b   : > { %460 = vmatmul.mubr.bf16.gmra.mrb[8].mxu0 %v293_v25 }
  0x9c   : > { %469 = vmatprep.mubr.bf16.mxu0 %v1646_v0 }
  0xa3   : > { %470 = vmatmul.mubr.bf16.gmra.mrb[12].mxu0 %v294_v28 }
  0xa4   : > { %479 = vmatprep.mubr.bf16.mxu0 %v1646_v0 }
  0xab   : > { %480 = vmatmul.mubr.bf16.gmra.mrb[16].mxu0 %v295_v31 }
  0xac   : > { %489 = vmatprep.mubr.bf16.mxu0 %v1646_v0 }
  0xb3   : > { %490 = vmatmul.mubr.bf16.gmra.mrb[20].mxu0 %v296_v34 }
  0xb4   : > { %499 = vmatprep.mubr.bf16.mxu0 %v1646_v0 }
  0xbb   : > { %500 = vmatmul.mubr.bf16.gmra.mrb[24].mxu0 %v297_v37 }
  0xbc   : > { %509 = vmatprep.mubr.bf16.mxu0 %v1646_v0 }
  0xc3   : > { %510 = vmatmul.mubr.bf16.gmra.mrb[28].mxu0 %v298_v40 }
 0x15e   : > { %v441_v54 = vpop.f32.mrb[0].mxu0 }
 0x15f   : > { %v442_v55 = vadd.f32 %v441_v54, %v1955_v53  ;;  %v1958_v56 = vpop.f32.mrb[1].mxu0 }
 0x160   : > { %v445_v57 = vpop.f32.mrb[2].mxu0 }
 0x161   : > { %v1119_v58 = vmul.f32 -1.442695, %v442_v55  ;;  %v446_v59 = vadd.f32 %v445_v57, %v1955_v53  ;;  %v1961_v60 = vpop.f32.mrb[3].mxu0 }
 0x163   : > { %1321 = vpow2.f32 %v1119_v58  ;;  %v1120_v61 = vmul.f32 -1.442695, %v446_v59 }
 0x165   : > { %1323 = vpow2.f32 %v1120_v61 }
 0x166   : > { %v451_v62 = vpop.f32.mrb[4].mxu0 }
 0x167   : > { %v452_v63 = vadd.f32 %v451_v62, %v1955_v53  ;;  %v1964_v0 = vpop.f32.mrb[5].mxu0 }
 0x168   : > { %v455_v1 = vpop.f32.mrb[6].mxu0 }
 0x169   : > { %v1121_v2 = vmul.f32 -1.442695, %v452_v63  ;;  %v456_v3 = vadd.f32 %v455_v1, %v1955_v53  ;;  %v1967_v4 = vpop.f32.mrb[7].mxu0 }
 0x16b   : > { %1325 = vpow2.f32 %v1121_v2  ;;  %v1122_v5 = vmul.f32 -1.442695, %v456_v3 }
 0x16d   : > { %v1322_v6 = vpop.eup %1321  ;;  %1327 = vpow2.f32 %v1122_v5 }
 0x16e   : > { %v568_v7 = vadd.f32 1.0, %v1322_v6  ;;  %v461_v8 = vpop.f32.mrb[8].mxu0 }
 0x16f   : > { %v1324_v9 = vpop.eup %1323  ;;  %v462_v10 = vadd.f32 %v461_v8, %v1955_v53  ;;  %v1970_v11 = vpop.f32.mrb[9].mxu0 }
 0x170   : > { %1329 = vrcp.f32 %v568_v7  ;;  %v569_v12 = vadd.f32 1.0, %v1324_v9  ;;  %v465_v13 = vpop.f32.mrb[10].mxu0 }
 0x171   : > { %v1123_v14 = vmul.f32 -1.442695, %v462_v10  ;;  %v466_v15 = vadd.f32 %v465_v13, %v1955_v53  ;;  %v1973_v16 = vpop.f32.mrb[11].mxu0 }
 0x172   : > { %1331 = vrcp.f32 %v569_v12 }
 0x173   : > { %v1124_v19 = vmul.f32 -1.442695, %v466_v15  ;;  %1333 = vpow2.f32 %v1123_v14 }
 0x175   : > { %v1326_v22 = vpop.eup %1325  ;;  %1335 = vpow2.f32 %v1124_v19 }
 0x176   : > { %v570_v25 = vadd.f32 1.0, %v1326_v22  ;;  %v471_v28 = vpop.f32.mrb[12].mxu0 }
 0x177   : > { %v1328_v31 = vpop.eup %1327  ;;  %v472_v34 = vadd.f32 %v471_v28, %v1955_v53  ;;  %v1976_v37 = vpop.f32.mrb[13].mxu0 }
 0x178   : > { %1337 = vrcp.f32 %v570_v25  ;;  %v571_v40 = vadd.f32 1.0, %v1328_v31  ;;  %v475_v41 = vpop.f32.mrb[14].mxu0 }
 0x179   : > { %v1125_v42 = vmul.f32 -1.442695, %v472_v34  ;;  %v476_v43 = vadd.f32 %v475_v41, %v1955_v53  ;;  %v1979_v44 = vpop.f32.mrb[15].mxu0 }
 0x17a   : > { %v1330_v45 = vpop.eup %1329  ;;  %1339 = vrcp.f32 %v571_v40 }
 0x17b   : > { %v1126_v46 = vmul.f32 -1.442695, %v476_v43  ;;  %1341 = vpow2.f32 %v1125_v42  ;;  %v616_v48 = vmul.f32 %v1330_v45, %v1876_v17 }
 0x17c   : > { %v1332_v47 = vpop.eup %1331 }
 0x17d   : > { %v617_v49 = vmul.f32 %v1332_v47, %v1879_v18  ;;  %v1334_v51 = vpop.eup %1333  ;;  %1343 = vpow2.f32 %v1126_v46 }
 0x17e   : > { %v481_v54 = vpop.f32.mrb[16].mxu0  ;;  %v572_v55 = vadd.f32 1.0, %v1334_v51 }
 0x17f   : > { %v482_v57 = vadd.f32 %v481_v54, %v1955_v53  ;;  %v1984_v58 = vpop.f32.mrb[17].mxu0  ;;  %v632_v59 = vpack.c.bf16 %v617_v49, %v616_v48  ;;  %v1336_v61 = vpop.eup %1335 }
 0x180   : > { %v485_v62 = vpop.f32.mrb[18].mxu0  ;;  %1345 = vrcp.f32 %v572_v55  ;;  %v573_v63 = vadd.f32 1.0, %v1336_v61 }
 0x181   : > { %v1127_v1 = vmul.f32 -1.442695, %v482_v57  ;;  %v486_v2 = vadd.f32 %v485_v62, %v1955_v53  ;;  %v1987_v3 = vpop.f32.mrb[19].mxu0  ;;  %1199 = vmatprep.mubr.bf16.mxu1 %v632_v59 }
 0x182   : > { %v1338_v5 = vpop.eup %1337  ;;  %1347 = vrcp.f32 %v573_v63 }
 0x183   : > { %v1128_v6 = vmul.f32 -1.442695, %v486_v2  ;;  %1349 = vpow2.f32 %v1127_v1  ;;  %v618_v8 = vmul.f32 %v1338_v5, %v1885_v20 }
 0x184   : > { %v1340_v7 = vpop.eup %1339 }
 0x185   : > { %v619_v9 = vmul.f32 %v1340_v7, %v1888_v21  ;;  %v1342_v10 = vpop.eup %1341  ;;  %1351 = vpow2.f32 %v1128_v6 }
 0x186   : > { %v491_v12 = vpop.f32.mrb[20].mxu0  ;;  %v574_v13 = vadd.f32 1.0, %v1342_v10 }
 0x187   : > { %v492_v14 = vadd.f32 %v491_v12, %v1955_v53  ;;  %v1992_v15 = vpop.f32.mrb[21].mxu0  ;;  %v633_v19 = vpack.c.bf16 %v619_v9, %v618_v8  ;;  %v1344_v22 = vpop.eup %1343 }
 0x188   : > { %v495_v25 = vpop.f32.mrb[22].mxu0  ;;  %1353 = vrcp.f32 %v574_v13  ;;  %v575_v28 = vadd.f32 1.0, %v1344_v22 }
 0x189   : > { %v1129_v31 = vmul.f32 -1.442695, %v492_v14  ;;  %v496_v34 = vadd.f32 %v495_v25, %v1955_v53  ;;  %v1995_v40 = vpop.f32.mrb[23].mxu0  ;;  %1200 = vmatmul.mubr.bf16.vlgmr.msra.gmra.mrb[0].mxu1 %v633_v19 }
 0x18a   : > { %v1346_v41 = vpop.eup %1345  ;;  %1355 = vrcp.f32 %v575_v28 }
 0x18b   : > { %v1130_v42 = vmul.f32 -1.442695, %v496_v34  ;;  %1357 = vpow2.f32 %v1129_v31  ;;  %v620_v46 = vmul.f32 %v1346_v41, %v1894_v23 }
 0x18c   : > { %v1348_v43 = vpop.eup %1347 }
 0x18d   : > { %v621_v47 = vmul.f32 %v1348_v43, %v1897_v24  ;;  %v1350_v48 = vpop.eup %1349  ;;  %1359 = vpow2.f32 %v1130_v42 }
 0x18e   : > { %v501_v45 = vpop.f32.mrb[24].mxu0  ;;  %v576_v54 = vadd.f32 1.0, %v1350_v48 }
 0x18f   : > { %v502_v49 = vadd.f32 %v501_v45, %v1955_v53  ;;  %v2000_v51 = vpop.f32.mrb[25].mxu0  ;;  %v634_v57 = vpack.c.bf16 %v621_v47, %v620_v46  ;;  %v1352_v59 = vpop.eup %1351 }
 0x190   : > { %v505_v55 = vpop.f32.mrb[26].mxu0  ;;  %1361 = vrcp.f32 %v576_v54  ;;  %v577_v63 = vadd.f32 1.0, %v1352_v59 }
 0x191   : > { %v506_v61 = vadd.f32 %v505_v55, %v1955_v53  ;;  %v2003_v62 = vpop.f32.mrb[27].mxu0  ;;  %v1131_v1 = vmul.f32 -1.442695, %v502_v49  ;;  %1203 = vmatprep.mubr.bf16.mxu1 %v634_v57 }
 0x192   : > { %v1354_v2 = vpop.eup %1353  ;;  %1363 = vrcp.f32 %v577_v63 }
 0x193   : > { %v1132_v5 = vmul.f32 -1.442695, %v506_v61  ;;  %1365 = vpow2.f32 %v1131_v1  ;;  %v622_v8 = vmul.f32 %v1354_v2, %v1903_v26 }
 0x194   : > { %v1356_v6 = vpop.eup %1355 }
 0x195   : > { %v623_v9 = vmul.f32 %v1356_v6, %v1906_v27  ;;  %v1358_v10 = vpop.eup %1357  ;;  %1367 = vpow2.f32 %v1132_v5 }
 0x196   : > { %v511_v7 = vpop.f32.mrb[28].mxu0  ;;  %v578_v14 = vadd.f32 1.0, %v1358_v10 }
 0x197   : > { %v512_v12 = vadd.f32 %v511_v7, %v1955_v53  ;;  %v2008_v13 = vpop.f32.mrb[29].mxu0  ;;  %v635_v22 = vpack.c.bf16 %v623_v9, %v622_v8  ;;  %v1360_v25 = vpop.eup %1359 }
 0x198   : > { %v515_v19 = vpop.f32.mrb[30].mxu0  ;;  %1369 = vrcp.f32 %v578_v14  ;;  %v579_v34 = vadd.f32 1.0, %v1360_v25 }
 0x199   : > { %v516_v28 = vadd.f32 %v515_v19, %v1955_v53  ;;  %v2011_v31 = vpop.f32.mrb[31].mxu0  ;;  %v1133_v41 = vmul.f32 -1.442695, %v512_v12  ;;  %1204 = vmatmul.mubr.bf16.gmra.mrb[4].mxu1 %v635_v22 }
 0x19a   : > { %v1362_v42 = vpop.eup %1361  ;;  %1371 = vrcp.f32 %v579_v34 }
 0x19b   : > { %v1134_v43 = vmul.f32 -1.442695, %v516_v28  ;;  %1373 = vpow2.f32 %v1133_v41  ;;  %v624_v46 = vmul.f32 %v1362_v42, %v1912_v29  ;;  %v323_v41 = vsub.s32 1, %v1946_v50 }
 0x19c   : > { %v1364_v45 = vpop.eup %1363 }
 0x19d   : > { %v625_v47 = vmul.f32 %v1364_v45, %v1915_v30  ;;  %v1366_v48 = vpop.eup %1365  ;;  %1375 = vpow2.f32 %v1134_v43  ;;  %v2023_v42 = vrot.slane %v1952_v52, %v323_v41 }
 0x19e   : > { %v580_v49 = vadd.f32 1.0, %v1366_v48 }
 0x19f   : > { %v636_v54 = vpack.c.bf16 %v625_v47, %v624_v46  ;;  %v1368_v53 = vpop.eup %1367  ;;  %v444_v43 = vadd.f32 %v1958_v56, %v2023_v42  ;;  %v448_v45 = vadd.f32 %v1961_v60, %v2023_v42  ;;  %v454_v47 = vadd.f32 %v1964_v0, %v2023_v42 }
 0x1a0   : > { %1377 = vrcp.f32 %v580_v49  ;;  %v581_v55 = vadd.f32 1.0, %v1368_v53  ;;  %v458_v49 = vadd.f32 %v1967_v4, %v2023_v42  ;;  %v464_v56 = vadd.f32 %v1970_v11, %v2023_v42 }
 0x1a1   : > { %1207 = vmatprep.mubr.bf16.mxu1 %v636_v54  ;;  %v1144_v46 = vmul.f32 -1.442695, %v444_v43  ;;  %v1145_v48 = vmul.f32 -1.442695, %v448_v45  ;;  %v1146_v54 = vmul.f32 -1.442695, %v454_v47  ;;  %v468_v60 = vadd.f32 %v1973_v16, %v2023_v42 }
 0x1a2   : > { %v1370_v57 = vpop.eup %1369  ;;  %1379 = vrcp.f32 %v581_v55  ;;  %v1147_v50 = vmul.f32 -1.442695, %v458_v49  ;;  %v474_v4 = vadd.f32 %v1976_v37, %v2023_v42  ;;  %v494_v45 = vadd.f32 %v1992_v15, %v2023_v42 }
 0x1a3   : > { %v626_v61 = vmul.f32 %v1370_v57, %v1921_v32 }
 0x1a4   : > { %v1372_v59 = vpop.eup %1371  ;;  %v1150_v11 = vmul.f32 -1.442695, %v474_v4 }
 0x1a5   : > { %v627_v63 = vmul.f32 %v1372_v59, %v1924_v33  ;;  %v1374_v1 = vpop.eup %1373 }
 0x1a6   : > { %v582_v2 = vadd.f32 1.0, %v1374_v1  ;;  %v478_v1 = vadd.f32 %v1979_v44, %v2023_v42 }
 0x1a7   : > { %v637_v5 = vpack.c.bf16 %v627_v63, %v626_v61  ;;  %v1376_v6 = vpop.eup %1375  ;;  %v1148_v61 = vmul.f32 -1.442695, %v464_v56  ;;  %v1149_v63 = vmul.f32 -1.442695, %v468_v60 }
 0x1a8   : > { %1381 = vrcp.f32 %v582_v2  ;;  %v583_v7 = vadd.f32 1.0, %v1376_v6  ;;  %v1151_v16 = vmul.f32 -1.442695, %v478_v1  ;;  %v2044_v6 = vld [vmem:[%s2169_s4] ss:$0 sm:$0xff] }
 0x1a9   : > { %1208 = vmatmul.mubr.bf16.gmra.mrb[8].mxu1 %v637_v5 }
 0x1aa   : > { %v1378_v8 = vpop.eup %1377  ;;  %1383 = vrcp.f32 %v583_v7 }
 0x1ab   : > { %v628_v10 = vmul.f32 %v1378_v8, %v1930_v35  ;;  %1385 = vpow2.f32 %v1144_v46 }
 0x1ac   : > { %v1380_v9 = vpop.eup %1379  ;;  %1387 = vpow2.f32 %v1145_v48 }
 0x1ad   : > { %v629_v12 = vmul.f32 %v1380_v9, %v1933_v36  ;;  %1389 = vpow2.f32 %v1146_v54 }
 0x1ae   : > { %1391 = vpow2.f32 %v1147_v50 }
 0x1af   : > { %v638_v14 = vpack.c.bf16 %v629_v12, %v628_v10 }
 0x1b1   : > { %1211 = vmatprep.mubr.bf16.mxu1 %v638_v14  ;;  %v484_v14 = vadd.f32 %v1984_v58, %v2023_v42  ;;  %v498_v58 = vadd.f32 %v1995_v40, %v2023_v42 }
 0x1b2   : > { %v1382_v19 = vpop.eup %1381 }
 0x1b3   : > { %v630_v25 = vmul.f32 %v1382_v19, %v1939_v38  ;;  %v1152_v43 = vmul.f32 -1.442695, %v484_v14  ;;  %v1155_v56 = vmul.f32 -1.442695, %v498_v58 }
 0x1b4   : > { %v1384_v22 = vpop.eup %1383 }
 0x1b5   : > { %v631_v28 = vmul.f32 %v1384_v22, %v1942_v39  ;;  %v1386_v52 = vpop.eup %1385 }
 0x1b6   : > { %v1388_v53 = vpop.eup %1387  ;;  %v872_v55 = vadd.f32 1.0, %v1386_v52 }
 0x1b7   : > { %v639_v34 = vpack.c.bf16 %v631_v28, %v630_v25  ;;  %v1390_v0 = vpop.eup %1389  ;;  %v873_v57 = vadd.f32 1.0, %v1388_v53  ;;  %v488_v25 = vadd.f32 %v1987_v3, %v2023_v42  ;;  %v1154_v3 = vmul.f32 -1.442695, %v494_v45 }
 0x1b8   : > { %v1392_v59 = vpop.eup %1391  ;;  %1393 = vrcp.f32 %v872_v55  ;;  %v874_v2 = vadd.f32 1.0, %v1390_v0 }
 0x1b9   : > { %1212 = vmatmul.mubr.bf16.gmra.mrb[12].mxu1 %v639_v34  ;;  %1395 = vrcp.f32 %v873_v57  ;;  %v875_v5 = vadd.f32 1.0, %v1392_v59  ;;  %v1153_v47 = vmul.f32 -1.442695, %v488_v25  ;;  %v508_v25 = vadd.f32 %v2003_v62, %v2023_v42 }
 0x1ba   : > { %1397 = vpow2.f32 %v1148_v61 }
 0x1bb   : > { %1399 = vpow2.f32 %v1149_v63 }
 0x1bc   : > { %1401 = vrcp.f32 %v874_v2 }
 0x1bd   : > { %1403 = vrcp.f32 %v875_v5 }
 0x1be   : > { %1405 = vpow2.f32 %v1150_v11 }
 0x1bf   : > { %1407 = vpow2.f32 %v1151_v16 }
 0x1c2   : > { %v1394_v22 = vpop.eup %1393 }
 0x1c3   : > { %v1396_v28 = vpop.eup %1395  ;;  %v920_v59 = vsub.f32 1.0, %v1394_v22 }
 0x1c4   : > { %v1398_v34 = vpop.eup %1397  ;;  %v921_v5 = vsub.f32 1.0, %v1396_v28 }
 0x1c5   : > { %v1400_v41 = vpop.eup %1399  ;;  %v876_v49 = vadd.f32 1.0, %v1398_v34 }
 0x1c6   : > { %v1402_v46 = vpop.eup %1401  ;;  %v877_v50 = vadd.f32 1.0, %v1400_v41 }
 0x1c7   : > { %v1404_v48 = vpop.eup %1403  ;;  %v922_v55 = vsub.f32 1.0, %v1402_v46 }
 0x1c8   : > { %v1406_v54 = vpop.eup %1405  ;;  %v923_v63 = vsub.f32 1.0, %v1404_v48  ;;  %v1157_v48 = vmul.f32 -1.442695, %v508_v25 }
 0x1c9   : > { %v1408_v52 = vpop.eup %1407  ;;  %v878_v0 = vadd.f32 1.0, %v1406_v54 }
 0x1ca   : > { %v879_v40 = vadd.f32 1.0, %v1408_v52 }
 0x25c   : > { %v1201_v37 = vpop.f32.mrb[0].mxu1 }
 0x25d   : > { %v754_v7 = vadd.f32 %v1201_v37, %v2044_v6  ;;  %v745_v44 = vpop.f32.mrb[1].mxu1 }
 0x25e   : > { %v746_v8 = vadd.f32 %v2044_v6, %v745_v44  ;;  %v1202_v9 = vpop.f32.mrb[2].mxu1 }
 0x25f   : > { %1409 = vtanh.f32 %v754_v7  ;;  %v757_v10 = vadd.f32 %v1202_v9, %v2044_v6  ;;  %v748_v12 = vpop.f32.mrb[3].mxu1 }
 0x260   : > { %1411 = vtanh.f32 %v746_v8  ;;  %v749_v19 = vadd.f32 %v2044_v6, %v748_v12 }
 0x261   : > { %1413 = vtanh.f32 %v757_v10 }
 0x262   : > { %1415 = vtanh.f32 %v749_v19  ;;  %v504_v19 = vadd.f32 %v2000_v51, %v2023_v42 }
 0x263   : > { %1417 = vpow2.f32 %v1152_v43 }
 0x264   : > { %1419 = vpow2.f32 %v1153_v47  ;;  %v1156_v46 = vmul.f32 -1.442695, %v504_v19  ;;  %v514_v47 = vadd.f32 %v2008_v13, %v2023_v42 }
 0x265   : > { %1421 = vrcp.f32 %v876_v49  ;;  %v518_v49 = vadd.f32 %v2011_v31, %v2023_v42 }
 0x266   : > { %1423 = vrcp.f32 %v877_v50 }
 0x267   : > { %1425 = vpow2.f32 %v1154_v3 }
 0x268   : > { %1427 = vpow2.f32 %v1155_v56 }
 0x269   : > { %v1410_v53 = vpop.eup %1409  ;;  %1429 = vrcp.f32 %v878_v0 }
 0x26a   : > { %v1412_v60 = vpop.eup %1411  ;;  %v938_v15 = vsub.f32 %v1410_v53, %v1885_v20  ;;  %1431 = vrcp.f32 %v879_v40  ;;  %v1158_v53 = vmul.f32 -1.442695, %v514_v47 }
 0x26b   : > { %v1414_v57 = vpop.eup %1413  ;;  %v936_v61 = vsub.f32 %v1412_v60, %v1876_v17 }
 0x26c   : > { %v1416_v4 = vpop.eup %1415  ;;  %v954_v1 = vmul.f32 %v938_v15, %v922_v55  ;;  %v939_v2 = vsub.f32 %v1414_v57, %v1888_v21  ;;  %v1205_v37 = vpop.f32.mrb[4].mxu1  ;;  %v1159_v55 = vmul.f32 -1.442695, %v518_v49 }
 0x26d   : > { %v952_v11 = vmul.f32 %v936_v61, %v920_v59  ;;  %v937_v16 = vsub.f32 %v1416_v4, %v1879_v18  ;;  %v770_v20 = vadd.f32 %v1205_v37, %v2044_v6  ;;  %v761_v7 = vpop.f32.mrb[5].mxu1  ;;  %v1418_v12 = vpop.eup %1417 }
 0x26e   : > { %970 = vst [vmem:[%s2064_s28 + $0x10] sm:$0xff] %v954_v1  ;;  %v955_v17 = vmul.f32 %v939_v2, %v923_v63  ;;  %v762_v44 = vadd.f32 %v2044_v6, %v761_v7  ;;  %v1206_v18 = vpop.f32.mrb[6].mxu1  ;;  %v1420_v14 = vpop.eup %1419  ;;  %v880_v34 = vadd.f32 1.0, %v1418_v12 }
 0x26f   : > { %968 = vst [vmem:[%s2064_s28] sm:$0xff] %v952_v11  ;;  %v953_v21 = vmul.f32 %v937_v16, %v921_v5  ;;  %1433 = vtanh.f32 %v770_v20  ;;  %v773_v8 = vadd.f32 %v1206_v18, %v2044_v6  ;;  %v764_v9 = vpop.f32.mrb[7].mxu1  ;;  %v1422_v22 = vpop.eup %1421  ;;  %v881_v43 = vadd.f32 1.0, %v1420_v14 }
 0x270   : > { %971 = vst [vmem:[%s2064_s28 + $0x18] sm:$0xff] %v955_v17  ;;  %1435 = vtanh.f32 %v762_v44  ;;  %v765_v10 = vadd.f32 %v2044_v6, %v764_v9  ;;  %v1424_v28 = vpop.eup %1423  ;;  %v924_v13 = vsub.f32 1.0, %v1422_v22 }
 0x271   : > { %969 = vst [vmem:[%s2064_s28 + $0x8] sm:$0xff] %v953_v21  ;;  %1437 = vtanh.f32 %v773_v8  ;;  %v1426_v41 = vpop.eup %1425  ;;  %v925_v59 = vsub.f32 1.0, %v1424_v28 }
 0x272   : > { %1439 = vtanh.f32 %v765_v10  ;;  %v1428_v45 = vpop.eup %1427  ;;  %v882_v54 = vadd.f32 1.0, %v1426_v41 }
 0x273   : > { %v1430_v58 = vpop.eup %1429  ;;  %1441 = vrcp.f32 %v880_v34  ;;  %v883_v62 = vadd.f32 1.0, %v1428_v45 }
 0x274   : > { %v1432_v51 = vpop.eup %1431  ;;  %1443 = vrcp.f32 %v881_v43  ;;  %v926_v3 = vsub.f32 1.0, %v1430_v58 }
 0x275   : > { %1445 = vpow2.f32 %v1156_v46  ;;  %v927_v42 = vsub.f32 1.0, %v1432_v51 }
 0x276   : > { %1447 = vpow2.f32 %v1157_v48 }
 0x277   : > { %1449 = vrcp.f32 %v882_v54 }
 0x278   : > { %1451 = vrcp.f32 %v883_v62 }
 0x279   : > { %v1434_v50 = vpop.eup %1433  ;;  %1453 = vpow2.f32 %v1158_v53 }
 0x27a   : > { %v1436_v52 = vpop.eup %1435  ;;  %v942_v56 = vsub.f32 %v1434_v50, %v1903_v26  ;;  %1455 = vpow2.f32 %v1159_v55 }
 0x27b   : > { %v1438_v60 = vpop.eup %1437  ;;  %v940_v0 = vsub.f32 %v1436_v52, %v1894_v23 }
 0x27c   : > { %v1440_v31 = vpop.eup %1439  ;;  %v958_v15 = vmul.f32 %v942_v56, %v926_v3  ;;  %v943_v57 = vsub.f32 %v1438_v60, %v1906_v27  ;;  %v1209_v61 = vpop.f32.mrb[8].mxu1 }
 0x27d   : > { %v956_v40 = vmul.f32 %v940_v0, %v924_v13  ;;  %v941_v26 = vsub.f32 %v1440_v31, %v1897_v24  ;;  %v786_v23 = vadd.f32 %v1209_v61, %v2044_v6  ;;  %v777_v63 = vpop.f32.mrb[9].mxu1  ;;  %v1442_v16 = vpop.eup %1441 }
 0x27e   : > { %974 = vst [vmem:[%s2064_s28 + $0x30] sm:$0xff] %v958_v15  ;;  %v959_v4 = vmul.f32 %v943_v57, %v927_v42  ;;  %v778_v2 = vadd.f32 %v2044_v6, %v777_v63  ;;  %v1210_v27 = vpop.f32.mrb[10].mxu1  ;;  %v1444_v37 = vpop.eup %1443  ;;  %v928_v28 = vsub.f32 1.0, %v1442_v16 }
 0x27f   : > { %972 = vst [vmem:[%s2064_s28 + $0x20] sm:$0xff] %v956_v40  ;;  %v957_v1 = vmul.f32 %v941_v26, %v925_v59  ;;  %1457 = vtanh.f32 %v786_v23  ;;  %v789_v5 = vadd.f32 %v1210_v27, %v2044_v6  ;;  %v780_v11 = vpop.f32.mrb[11].mxu1  ;;  %v1446_v17 = vpop.eup %1445  ;;  %v929_v58 = vsub.f32 1.0, %v1444_v37 }
 0x280   : > { %975 = vst [vmem:[%s2064_s28 + $0x38] sm:$0xff] %v959_v4  ;;  %1459 = vtanh.f32 %v778_v2  ;;  %v781_v24 = vadd.f32 %v2044_v6, %v780_v11  ;;  %v1448_v20 = vpop.eup %1447  ;;  %v884_v8 = vadd.f32 1.0, %v1446_v17 }
 0x281   : > { %973 = vst [vmem:[%s2064_s28 + $0x28] sm:$0xff] %v957_v1  ;;  %1461 = vtanh.f32 %v789_v5  ;;  %v1450_v7 = vpop.eup %1449  ;;  %v885_v10 = vadd.f32 1.0, %v1448_v20 }
 0x282   : > { %1463 = vtanh.f32 %v781_v24  ;;  %v1452_v21 = vpop.eup %1451  ;;  %v930_v14 = vsub.f32 1.0, %v1450_v7 }
 0x283   : > { %v1454_v44 = vpop.eup %1453  ;;  %v931_v45 = vsub.f32 1.0, %v1452_v21  ;;  %1465 = vrcp.f32 %v884_v8 }
 0x284   : > { %v1456_v18 = vpop.eup %1455  ;;  %v886_v19 = vadd.f32 1.0, %v1454_v44  ;;  %1467 = vrcp.f32 %v885_v10 }
 0x285   : > { %v887_v34 = vadd.f32 1.0, %v1456_v18 }
 0x286   : > { %1469 = vrcp.f32 %v886_v19 }
 0x287   : > { %1471 = vrcp.f32 %v887_v34 }
 0x289   : > { %v1458_v9 = vpop.eup %1457 }
 0x28a   : > { %v1460_v12 = vpop.eup %1459  ;;  %v946_v22 = vsub.f32 %v1458_v9, %v1921_v32 }
 0x28b   : > { %v1462_v25 = vpop.eup %1461  ;;  %v944_v41 = vsub.f32 %v1460_v12, %v1912_v29 }
 0x28c   : > { %v1464_v43 = vpop.eup %1463  ;;  %v962_v46 = vmul.f32 %v946_v22, %v930_v14  ;;  %v947_v47 = vsub.f32 %v1462_v25, %v1924_v33  ;;  %v1213_v32 = vpop.f32.mrb[12].mxu1 }
 0x28d   : > { %v960_v48 = vmul.f32 %v944_v41, %v928_v28  ;;  %v945_v49 = vsub.f32 %v1464_v43, %v1915_v30  ;;  %v802_v29 = vadd.f32 %v1213_v32, %v2044_v6  ;;  %v793_v54 = vpop.f32.mrb[13].mxu1  ;;  %v1466_v53 = vpop.eup %1465 }
 0x28e   : > { %978 = vst [vmem:[%s2064_s28 + $0x50] sm:$0xff] %v962_v46  ;;  %v963_v51 = vmul.f32 %v947_v47, %v931_v45  ;;  %v794_v62 = vadd.f32 %v2044_v6, %v793_v54  ;;  %v1214_v33 = vpop.f32.mrb[14].mxu1  ;;  %v1468_v56 = vpop.eup %1467  ;;  %v932_v57 = vsub.f32 1.0, %v1466_v53 }
 0x28f   : > { %976 = vst [vmem:[%s2064_s28 + $0x40] sm:$0xff] %v960_v48  ;;  %v961_v50 = vmul.f32 %v945_v49, %v929_v58  ;;  %1473 = vtanh.f32 %v802_v29  ;;  %v805_v52 = vadd.f32 %v1214_v33, %v2044_v6  ;;  %v796_v3 = vpop.f32.mrb[15].mxu1  ;;  %v933_v4 = vsub.f32 1.0, %v1468_v56 }
 0x290   : > { %979 = vst [vmem:[%s2064_s28 + $0x58] sm:$0xff] %v963_v51  ;;  %1475 = vtanh.f32 %v794_v62  ;;  %v797_v30 = vadd.f32 %v2044_v6, %v796_v3  ;;  %v1470_v60 = vpop.eup %1469 }
 0x291   : > { %977 = vst [vmem:[%s2064_s28 + $0x48] sm:$0xff] %v961_v50  ;;  %1477 = vtanh.f32 %v805_v52  ;;  %v1472_v13 = vpop.eup %1471  ;;  %v934_v31 = vsub.f32 1.0, %v1470_v60 }
 0x292   : > { %1479 = vtanh.f32 %v797_v30  ;;  %v935_v40 = vsub.f32 1.0, %v1472_v13 }
 0x299   : > { %v1474_v55 = vpop.eup %1473 }
 0x29a   : > { %v1476_v0 = vpop.eup %1475  ;;  %v950_v42 = vsub.f32 %v1474_v55, %v1939_v38 }
 0x29b   : > { %v1478_v15 = vpop.eup %1477  ;;  %v948_v59 = vsub.f32 %v1476_v0, %v1930_v35 }
 0x29c   : > { %v1480_v6 = vpop.eup %1479  ;;  %v966_v26 = vmul.f32 %v950_v42, %v934_v31  ;;  %v951_v61 = vsub.f32 %v1478_v15, %v1942_v39 }
 0x29d   : > { %v964_v23 = vmul.f32 %v948_v59, %v932_v57  ;;  %v949_v38 = vsub.f32 %v1480_v6, %v1933_v36 }
 0x29e   : > { %982 = vst [vmem:[%s2064_s28 + $0x70] sm:$0xff] %v966_v26  ;;  %v967_v63 = vmul.f32 %v951_v61, %v935_v40 }
 0x29f   : > { %980 = vst [vmem:[%s2064_s28 + $0x60] sm:$0xff] %v964_v23  ;;  %v965_v35 = vmul.f32 %v949_v38, %v933_v4 }
 0x2a0   : > { %983 = vst [vmem:[%s2064_s28 + $0x78] sm:$0xff] %v967_v63 }
 0x2a1   : > { %981 = vst [vmem:[%s2064_s28 + $0x68] sm:$0xff] %v965_v35 }
 0x2a2   : > { %1580 = shalt.err (!%p1577_p1)
}
 0x2a3   : > { %s1581_s14 = scalar_lea.hbm %s2116_s12, 2048  ;;  %s1585_s15 = scalar_lea.hbm %s2170_s5, 4096 }
 0x2a4   : > { %p1582_p13 = scmp.ne.s32.totalorder %s2116_s12, %s1581_s14  ;;  %p1586_p4 = scmp.lt.u32.totalorder %s2116_s12, %s2170_s5 }
 0x2a5   : > { %p1587_p7 = scmp.lt.u32.totalorder %s1585_s15, %s1581_s14  ;;  %p1589_p11 = scmp.lt.u32.totalorder %s1581_s14, %s2116_s12 }
 0x2a6   : > { %p1583_p6 = pnand %p1582_p13, %p2184_p0 }
 0x2a7   : > { %p1588_p8 = por %p1587_p7, %p1586_p4 }
 0x2a8   : > { %p1584_p10 = pneg %p1583_p6 }
 0x2a9   : > { %p1590_p2 = por %p1589_p11, %p1588_p8 }
 0x2ab   : > { %p1591_p3 = pnand %p1590_p2, %p1584_p10 }
 0x2ad   : > { %1594 = shalt.err (!%p1591_p3)
}
 0x2ae   : > { %s1648_s13 = smov 128   ;;  %s1649_s11 = smov 8  }
 0x2af   : > { %1225 = dma.vmem_to_hbm [thread:$0]  (%p2184_p0), %s2118_s17, 2048, %s2116_s12, %s985_s22, %s1648_s13, %s1648_s13, %s1649_s11  }
 0x2b0 PF: > { %s1013_s29 = sand.u32 1, %s1625_s18   ;;  %p2185_p5 = scmp.ne.s32.totalorder %s2175_s25, 0 }
 0x2b1   : > { %p2186_p9 = scmp.ge.s32.totalorder %s1637_s21, 2  ;;  %s1014_s30 = scalar_lea.sflag [#allocation4], %s1013_s29 }
 0x2b3   : > { %p1239_p12 = pnand %p2186_p9, %p2185_p5 }
 0x2b5   : > { %1620 = dma.done.wait (!%p1239_p12), %s1014_s30, 2048  }
 0x2b6   : > { %1622 = vsyncadd (!%p1239_p12), %s1014_s30, 4294965248  ;;  %p19_p1 = scmp.ge.s32.totalorder %s1793_s23, 4   ;;  %s2187_s18 = smov %s1629_s19 }
 0x2b7   : > { %s2188_s19 = smov %s1633_s20  ;;  %s2189_s20 = smov %s1802_s7 }
 0x2b8   : > { %s2190_s21 = smov %s1793_s23  ;;  %21 = sbr.rel (!%p19_p1) target bundleno = 6 (0x6), region = 93 }
 0x2bf   :  { %1019 = vsyncpa [#allocation3], 1 }
 0x2c0   :  { %1021 = vsyncpa [#allocation3 + $0x1], 1 }
 0x2c1   :  { %1022 = vsyncpa [#allocation6], 1 }
 0x2c2   :  { %1023 = vsyncpa [#allocation4], 1 }
 0x2c3   :  { %1025 = vsyncpa [#allocation4 + $0x1], 1 }

// kernel: tpu_custom_call.1
= control target key start
LH: loop header
LB: loop body
LE: loop exit
PB: predicated region body
PF: predicated region fallthrough
CT: control target
= control target key end

     0   :  { %10 = vsyncpa [#allocation3], 0  ;;  %s2165_s0 = inlined_call_operand.hbm [shape: f32[256,128], index: 0, kind: input, shape index: {}]   ;;  %s2166_s1 = inlined_call_operand.hbm [shape: bf16[128,256], index: 1, kind: input, shape index: {}]   ;;  %s2167_s2 = inlined_call_operand.vmem [shape: f32[1,256], index: 2, kind: input, shape index: {}]   ;;  %s2168_s3 = inlined_call_operand.hbm [shape: bf16[128,128], index: 3, kind: input, shape index: {}]   ;;  %s2169_s4 = inlined_call_operand.vmem [shape: f32[1,128], index: 4, kind: input, shape index: {}]   ;;  %s2170_s5 = inlined_call_operand.hbm [shape: f32[256,128], index: 5, kind: output, shape index: {}]  }
   0x1   :  { %12 = vsyncpa [#allocation3 + $0x1], 0 }
   0x2   :  { %13 = vsyncpa [#allocation6], 0 }
   0x3   :  { %14 = vsyncpa [#allocation4], 0 }
   0x4   :  { %16 = vsyncpa [#allocation4 + $0x1], 0  ;;  %s1680_s18 = smov 0   ;;  %s1682_s19 = smov 0  }
   0x5   :  { %s1684_s20 = smov 0   ;;  %s1686_s21 = smov 0  }
   0x6 LB: > { %s1701_s22 = sadd.s32 4294967295, %s1637_s21   ;;  %s1090_s23 = sadd.s32 4294967294, %s1637_s21   ;;  %s1637_s21 = sphi %s1686_s21, %s2190_s21   ;;  %s1633_s20 = sphi %s1684_s20, %s2189_s20   ;;  %s1629_s19 = sphi %s1682_s19, %s2188_s19   ;;  %s1625_s18 = sphi %s1680_s18, %s2187_s18  }
   0x7   : > { %p42_p0 = scmp.ne.s32.totalorder %s1629_s19, %s1625_s18  ;;  %p2171_p1 = scmp.eq.s32.totalorder %s1701_s22, 0 }
   0x8   : > { %p156_p3 = scmp.eq.s32.totalorder %s1090_s23, 1  ;;  %p1091_p5 = scmp.ge.s32.totalorder %s1637_s21, 1 }
   0x9   : > { %p1710_p4 = por %p2171_p1, %p42_p0  ;;  %p163_p7 = scmp.lt.s32.totalorder %s1637_s21, 3 }
   0xa   : > { %p1715_p6 = por %p156_p3, %p42_p0  ;;  %s1639_s27 = smov [#allocation5]  }
   0xb   : > { %s2174_s24 = scalar_select %p1710_p4, 1, 0 }
   0xc   : > { %s2175_s25 = scalar_select %p1715_p6, 1, 0 }
   0xd   : > { %p1720_p8 = pnand %p1091_p5, %p163_p7  ;;  %s175_s28 = sshll.u32 %s1639_s27, 4  ;;  %s1724_s28 = int_to_ptr.vmem [resolvable:$true] %s175_s28 }
   0xe   : > { %s1640_s30 = smov [#allocation7]   ;;  %s1481_s9 = scalar_lea.hbm %s2166_s1, 2048 }
   0xf   : > { %p1227_p9 = pneg %p1720_p8  ;;  %s191_s6 = sshll.u32 %s1640_s30, 4  ;;  %s1735_s6 = int_to_ptr.vmem [resolvable:$true] %s191_s6 }
  0x10   : > { %p1482_p12 = scmp.ne.s32.totalorder %s2166_s1, %s1481_s9  ;;  %p1488_p5 = scmp.lt.u32.totalorder %s1481_s9, %s2166_s1 }
  0x11   : > { %p1731_p11 = pnand %p1227_p9, %p2171_p1 }
  0x13   : > { %p1483_p13 = pneg %p1731_p11 }
  0x15   : > { %p1484_p0 = pnand %p1483_p13, %p1482_p12 }
  0x17   : > { %p1485_p3 = pneg %p1484_p0 }
  0x19   : > { %p1490_p7 = pnand %p1488_p5, %p1485_p3 }
  0x1b   : > { %1493 = shalt.err (!%p1490_p7)
}
  0x1c   : > { %s1494_s14 = scalar_lea.vmem %s1724_s28, 2048  ;;  %p1502_p2 = scmp.lt.s32.totalorder %s1724_s28, %s1724_s28 }
  0x1d   : > { %p1495_p9 = scmp.ne.s32.totalorder %s1724_s28, %s1494_s14  ;;  %p1503_p12 = scmp.lt.s32.totalorder %s1494_s14, %s1494_s14 }
  0x1f   : > { %p1497_p10 = pnand %p1495_p9, %p1483_p13  ;;  %p1504_p0 = por %p1503_p12, %p1502_p2 }
  0x21   : > { %p1498_p1 = pneg %p1497_p10 }
  0x23   : > { %p1505_p6 = pnand %p1504_p0, %p1498_p1 }
  0x25   : > { %1508 = shalt.err (!%p1505_p6)
}
  0x26   : > { %s1641_s15 = smov 128   ;;  %s1642_s16 = smov 8  }
  0x27   : > { %1230 = dma.hbm_to_vmem [thread:$0]  (!%p1731_p11), %s2166_s1, 2048, %s1724_s28, [#allocation6], %s1641_s15, %s1641_s15, %s1642_s16  }
  0x28   : > { %s1509_s7 = scalar_lea.hbm %s2168_s3, 1024 }
  0x29   : > { %p1510_p1 = scmp.ne.s32.totalorder %s2168_s3, %s1509_s7  ;;  %p1516_p10 = scmp.lt.u32.totalorder %s1509_s7, %s2168_s3 }
  0x2b   : > { %p1512_p2 = pnand %p1510_p1, %p1483_p13 }
  0x2d   : > { %p1513_p6 = pneg %p1512_p2 }
  0x2f   : > { %p1518_p3 = pnand %p1516_p10, %p1513_p6 }
  0x31   : > { %1521 = shalt.err (!%p1518_p3)
}
  0x32   : > { %s1522_s28 = scalar_lea.vmem %s1735_s6, 1024  ;;  %p1530_p12 = scmp.lt.s32.totalorder %s1735_s6, %s1735_s6 }
  0x33   : > { %p1523_p5 = scmp.ne.s32.totalorder %s1735_s6, %s1522_s28  ;;  %p1531_p0 = scmp.lt.s32.totalorder %s1522_s28, %s1522_s28 }
  0x35   : > { %p1525_p7 = pnand %p1523_p5, %p1483_p13  ;;  %p1532_p1 = por %p1531_p0, %p1530_p12 }
  0x37   : > { %p1526_p9 = pneg %p1525_p7 }
  0x39   : > { %p1533_p2 = pnand %p1532_p1, %p1526_p9 }
  0x3b   : > { %1536 = shalt.err (!%p1533_p2)
}
  0x3c   : > { %s1643_s12 = smov 64   ;;  %s1644_s13 = smov 4  }
  0x3d   : > { %1233 = dma.hbm_to_vmem [thread:$0]  (!%p1731_p11), %s2168_s3, 1024, %s1735_s6, [#allocation6], %s1643_s12, %s1643_s12, %s1644_s13  }
  0x3e   : > { %s1793_s23 = sadd.s32 1, %s1637_s21   ;;  %s29_s30 = sadd.s32 1, %s1633_s20 }
  0x3f   : > { %s26_s27 = ssub.s32 %s1637_s21, %s1793_s23  ;;  %p36_p6 = scmp.ne.s32.totalorder %s1633_s20, %s1629_s19 }
  0x40   : > { %p27_p13 = scmp.eq.s32.totalorder %s26_s27, 0  ;;  %p37_p10 = scmp.eq.s32.totalorder %s1637_s21, 0 }
  0x41   : > { %p2178_p5 = scmp.eq.s32.totalorder %s1701_s22, 1  ;;  %p1244_p9 = scmp.lt.s32.totalorder %s1637_s21, 2 }
  0x42   : > { %s1802_s7 = scalar_select %p27_p13, %s1633_s20, %s29_s30  }
  0x43   : > { %p38_p3 = por %p37_p10, %p36_p6  ;;  %p1806_p7 = por %p2178_p5, %p36_p6 }
  0x44   : > { %s208_s29 = sand.u32 1, %s1633_s20   ;;  %s1165_s6 = sshll.u32 %s1637_s21, 11 }
  0x45   : > { %s2179_s8 = scalar_select %p1806_p7, 1, 0 }
  0x46   : > { %s1095_s9 = sshll.u32 %s208_s29, 7  ;;  %s1816_s28 = scalar_lea.hbm %s2165_s0, %s1165_s6 }
  0x47   : > { %s212_s12 = scalar_lea.vmem [#allocation2], %s1095_s9  ;;  %p1820_p11 = pnand %p1244_p9, %p38_p3 }
  0x48   : > { %s219_s13 = sshll.u32 %s212_s12, 4  ;;  %s1824_s17 = scalar_lea.sflag [#allocation3], %s208_s29  ;;  %s1818_s13 = int_to_ptr.vmem [resolvable:$true] %s219_s13 }
  0x49   : > { %s1537_s27 = scalar_lea.hbm %s1816_s28, 2048  ;;  %p1539_p0 = pneg %p1820_p11 }
  0x4a   : > { %p1538_p12 = scmp.ne.s32.totalorder %s1816_s28, %s1537_s27  ;;  %s1542_s6 = scalar_lea.hbm %s2165_s0, 4096 }
  0x4b   : > { %p1543_p13 = scmp.lt.u32.totalorder %s1816_s28, %s2165_s0  ;;  %p1544_p6 = scmp.lt.u32.totalorder %s1542_s6, %s1537_s27 }
  0x4c   : > { %p1540_p1 = pnand %p1539_p0, %p1538_p12  ;;  %p1546_p3 = scmp.lt.u32.totalorder %s1537_s27, %s1816_s28 }
  0x4d   : > { %p1545_p10 = por %p1544_p6, %p1543_p13 }
  0x4e   : > { %p1541_p2 = pneg %p1540_p1 }
  0x4f   : > { %p1547_p5 = por %p1546_p3, %p1545_p10 }
  0x51   : > { %p1548_p9 = pnand %p1547_p5, %p1541_p2 }
  0x53   : > { %1551 = shalt.err (!%p1548_p9)
}
  0x54   : > { %s1552_s29 = scalar_lea.vmem %s1818_s13, 2048  ;;  %s1645_s12 = smov [#allocation2]  }
  0x55   : > { %p1553_p12 = scmp.ne.s32.totalorder %s1818_s13, %s1552_s29  ;;  %s1557_s30 = sshll.u32 %s1645_s12, 4  ;;  %s1558_s30 = int_to_ptr.vmem [resolvable:$false] %s1557_s30 }
  0x56   : > { %s1559_s9 = scalar_lea.vmem %s1558_s30, 4096  ;;  %p1560_p4 = scmp.lt.s32.totalorder %s1818_s13, %s1558_s30 }
  0x57   : > { %p1555_p1 = pnand %p1553_p12, %p1539_p0  ;;  %p1561_p13 = scmp.lt.s32.totalorder %s1559_s9, %s1552_s29 }
  0x59   : > { %p1556_p7 = pneg %p1555_p1  ;;  %p1562_p6 = por %p1561_p13, %p1560_p4 }
  0x5b   : > { %p1563_p10 = pnand %p1562_p6, %p1556_p7 }
  0x5d   : > { %1566 = shalt.err (!%p1563_p10)
}
  0x5e   : > { %1237 = dma.hbm_to_vmem [thread:$0]  (!%p1820_p11), %s1816_s28, 2048, %s1818_s13, %s1824_s17, %s1641_s15, %s1641_s15, %s1642_s16  }
  0x5f   : > { %231 = sbr.rel (%p1720_p8) target bundleno = 688 (0x2b0), region = 40  ;;  %s1858_s27 = sand.u32 (!%p1720_p8), 1, %s1629_s19  }
  0x60   : > { %s1099_s6 = sshll.u32 (!%p1720_p8), %s1858_s27, 7  ;;  %s234_s10 = scalar_lea.sflag (!%p1720_p8), [#allocation3], %s1858_s27 }
  0x61   : > { %s1864_s14 = scalar_lea.vmem (!%p1720_p8), [#allocation2], %s1099_s6  ;;  %p2181_p4 = scmp.ne.s32.totalorder (!%p1720_p8), %s2174_s24, 0 }
  0x66   : > { %1612 = dma.done.wait (%p2181_p4), %s234_s10, 2048  }
  0x67   : > { %1614 = vsyncadd (%p2181_p4), %s234_s10, 4294965248  ;;  %p2182_p7 = scmp.eq.s32.totalorder %s1701_s22, 0 }
  0x69   : > { %1616 = dma.done.wait (%p2182_p7), [#allocation6], 3072   ;;  %p2183_p8 = pmov %p2182_p7 }
  0x6a   : > { %v1646_v0 = vmov 0   ;;  %v1289_v1 = vld [vmem:[#allocation5 + $0x4] ss:$8 sps:$4 sm:$0xff]   ;;  %v1291_v2 = vld [vmem:[#allocation5] ss:$8 sps:$4 sm:$0xff]   ;;  %v1885_v20 = vld [vmem:[%s1864_s14 + $0x10] sm:$0xff]  ;;  %v317_v49 = vlaneseq }
  0x6b   : > { %1618 = vsyncadd (%p2183_p8), [#allocation6], 4294964224  ;;  %439 = vmatprep.mubr.bf16.mxu0 %v1646_v0  ;;  %407 = vmatprep.subr.bf16.mxu0 %v1289_v1  ;;  %v1292_v3 = vld [vmem:[#allocation5 + $0x14] ss:$8 sps:$4 sm:$0xff]   ;;  %v1294_v4 = vld [vmem:[#allocation5 + $0x10] ss:$8 sps:$4 sm:$0xff]  }
  0x6c   : > { %408 = vmatpush1.bf16.msra.mxu0 %v1291_v2  ;;  %v1295_v5 = vld [vmem:[#allocation5 + $0x24] ss:$8 sps:$4 sm:$0xff]   ;;  %v1297_v6 = vld [vmem:[#allocation5 + $0x20] ss:$8 sps:$4 sm:$0xff]   ;;  %v1298_v7 = vld [vmem:[#allocation5 + $0x34] ss:$8 sps:$4 sm:$0xff]  }
  0x6d   : > { %409 = vmatprep.subr.bf16.mxu0 %v1292_v3  ;;  %v1300_v8 = vld [vmem:[#allocation5 + $0x30] ss:$8 sps:$4 sm:$0xff]   ;;  %v1301_v9 = vld [vmem:[#allocation5 + $0x44] ss:$8 sps:$4 sm:$0xff]   ;;  %v1303_v10 = vld [vmem:[#allocation5 + $0x40] ss:$8 sps:$4 sm:$0xff]  }
  0x6e   : > { %v1304_v11 = vld [vmem:[#allocation5 + $0x54] ss:$8 sps:$4 sm:$0xff]   ;;  %v1306_v12 = vld [vmem:[#allocation5 + $0x50] ss:$8 sps:$4 sm:$0xff]   ;;  %v1307_v13 = vld [vmem:[#allocation5 + $0x64] ss:$8 sps:$4 sm:$0xff]  }
  0x6f   : > { %v1309_v14 = vld [vmem:[#allocation5 + $0x60] ss:$8 sps:$4 sm:$0xff]   ;;  %v1310_v15 = vld [vmem:[#allocation5 + $0x74] ss:$8 sps:$4 sm:$0xff]   ;;  %v1312_v16 = vld [vmem:[#allocation5 + $0x70] ss:$8 sps:$4 sm:$0xff]  }
  0x70   : > { %410 = vmatpush1.bf16.msra.mxu0 %v1294_v4  ;;  %v1876_v17 = vld [vmem:[%s1864_s14] sm:$0xff]  ;;  %v1879_v18 = vld [vmem:[%s1864_s14 + $0x8] sm:$0xff]  ;;  %v1888_v21 = vld [vmem:[%s1864_s14 + $0x18] sm:$0xff]  ;;  %v1946_v50 = vshrl.u32 %v317_v49, 7  ;;  %s2064_s28 = scalar_lea.vmem [#allocation8], %s1099_s6  ;;  %s1166_s13 = sshll.u32 %s1701_s22, 11 }
  0x71   : > { %411 = vmatprep.subr.bf16.mxu0 %v1295_v5  ;;  %v291_v19 = vpack.c.bf16 %v1879_v18, %v1876_v17  ;;  %v292_v22 = vpack.c.bf16 %v1888_v21, %v1885_v20  ;;  %v1894_v23 = vld [vmem:[%s1864_s14 + $0x20] sm:$0xff]  ;;  %v1897_v24 = vld [vmem:[%s1864_s14 + $0x28] sm:$0xff]  ;;  %v1903_v26 = vld [vmem:[%s1864_s14 + $0x30] sm:$0xff]  ;;  %s998_s17 = sshll.u32 %s2064_s28, 4  ;;  %s2116_s12 = scalar_lea.hbm %s2170_s5, %s1166_s13  ;;  %s2118_s17 = int_to_ptr.vmem [resolvable:$true] %s998_s17 }
  0x72   : > { %v293_v25 = vpack.c.bf16 %v1897_v24, %v1894_v23  ;;  %v1906_v27 = vld [vmem:[%s1864_s14 + $0x38] sm:$0xff]  ;;  %v1912_v29 = vld [vmem:[%s1864_s14 + $0x40] sm:$0xff]  ;;  %v1915_v30 = vld [vmem:[%s1864_s14 + $0x48] sm:$0xff]  ;;  %v319_v51 = vsub.s32 0, %v1946_v50  ;;  %s985_s22 = scalar_lea.sflag [#allocation4], %s1858_s27  ;;  %s1567_s30 = scalar_lea.vmem %s2118_s17, 2048 }
  0x73   : > { %v294_v28 = vpack.c.bf16 %v1906_v27, %v1903_v26  ;;  %v295_v31 = vpack.c.bf16 %v1915_v30, %v1912_v29  ;;  %v1921_v32 = vld [vmem:[%s1864_s14 + $0x50] sm:$0xff]  ;;  %v1924_v33 = vld [vmem:[%s1864_s14 + $0x58] sm:$0xff]  ;;  %v1930_v35 = vld [vmem:[%s1864_s14 + $0x60] sm:$0xff]  ;;  %p1568_p11 = scmp.ne.s32.totalorder %s2118_s17, %s1567_s30  ;;  %p2184_p0 = scmp.ne.s32.totalorder %s2179_s8, 0 }
  0x74   : > { %412 = vmatpush1.bf16.msra.mxu0 %v1297_v6  ;;  %v296_v34 = vpack.c.bf16 %v1924_v33, %v1921_v32  ;;  %v1933_v36 = vld [vmem:[%s1864_s14 + $0x68] sm:$0xff]  ;;  %v1939_v38 = vld [vmem:[%s1864_s14 + $0x70] sm:$0xff]  ;;  %v1942_v39 = vld [vmem:[%s1864_s14 + $0x78] sm:$0xff]  ;;  %s1647_s9 = smov [#allocation8]  }
  0x75   : > { %413 = vmatprep.subr.bf16.mxu0 %v1298_v7  ;;  %v297_v37 = vpack.c.bf16 %v1933_v36, %v1930_v35  ;;  %v298_v40 = vpack.c.bf16 %v1942_v39, %v1939_v38  ;;  %v1313_v41 = vld [vmem:[#allocation7] sm:$0xff]   ;;  %v1314_v42 = vld [vmem:[#allocation7 + $0x8] sm:$0xff]   ;;  %v1315_v43 = vld [vmem:[#allocation7 + $0x10] sm:$0xff]   ;;  %p1569_p2 = pnand %p1568_p11, %p2184_p0  ;;  %s1571_s6 = sshll.u32 %s1647_s9, 4  ;;  %s1572_s6 = int_to_ptr.vmem [resolvable:$false] %s1571_s6 }
  0x76   : > { %1183 = vmatprep.subr.bf16.mxu1 %v1313_v41  ;;  %v1316_v44 = vld [vmem:[#allocation7 + $0x18] sm:$0xff]   ;;  %v1317_v45 = vld [vmem:[#allocation7 + $0x20] sm:$0xff]   ;;  %v1318_v46 = vld [vmem:[#allocation7 + $0x28] sm:$0xff]   ;;  %s1573_s10 = scalar_lea.vmem %s1572_s6, 4096  ;;  %p1574_p5 = scmp.lt.s32.totalorder %s2118_s17, %s1572_s6 }
  0x77   : > { %1184 = vmatpush3.bf16.msra.mxu1 %v1313_v41  ;;  %v1319_v47 = vld [vmem:[#allocation7 + $0x30] sm:$0xff]   ;;  %v1320_v48 = vld [vmem:[#allocation7 + $0x38] sm:$0xff]   ;;  %v1952_v52 = vld [vmem:[%s2167_s2] sm:$0x3]  ;;  %p1570_p3 = pneg %p1569_p2  ;;  %p1575_p9 = scmp.lt.s32.totalorder %s1573_s10, %s1567_s30 }
  0x78   : > { %414 = vmatpush1.bf16.msra.mxu0 %v1300_v8  ;;  %1185 = vmatprep.subr.bf16.mxu1 %v1314_v42  ;;  %v1955_v53 = vrot.slane %v1952_v52, %v319_v51 }
  0x79   : > { %415 = vmatprep.subr.bf16.mxu0 %v1301_v9  ;;  %p1576_p12 = por %p1575_p9, %p1574_p5 }
  0x7b   : > { %1186 = vmatpush3.bf16.msra.mxu1 %v1314_v42  ;;  %p1577_p1 = pnand %p1576_p12, %p1570_p3 }
  0x7c   : > { %416 = vmatpush1.bf16.msra.mxu0 %v1303_v10  ;;  %1187 = vmatprep.subr.bf16.mxu1 %v1315_v43 }
  0x7d   : > { %417 = vmatprep.subr.bf16.mxu0 %v1304_v11 }
  0x7f   : > { %1188 = vmatpush3.bf16.msra.mxu1 %v1315_v43 }
  0x80   : > { %418 = vmatpush1.bf16.msra.mxu0 %v1306_v12  ;;  %1189 = vmatprep.subr.bf16.mxu1 %v1316_v44 }
  0x81   : > { %419 = vmatprep.subr.bf16.mxu0 %v1307_v13 }
  0x83   : > { %1190 = vmatpush3.bf16.msra.mxu1 %v1316_v44 }
  0x84   : > { %420 = vmatpush1.bf16.msra.mxu0 %v1309_v14  ;;  %1191 = vmatprep.subr.bf16.mxu1 %v1317_v45 }
  0x85   : > { %421 = vmatprep.subr.bf16.mxu0 %v1310_v15 }
  0x87   : > { %1192 = vmatpush3.bf16.msra.mxu1 %v1317_v45 }
  0x88   : > { %422 = vmatpush1.bf16.msra.mxu0 %v1312_v16  ;;  %1193 = vmatprep.subr.bf16.mxu1 %v1318_v46 }
  0x8b   : > { %440 = vmatmul.mubr.bf16.vlgmr.msra.gmra.mrb[0].mxu0 %v291_v19  ;;  %1194 = vmatpush3.bf16.msra.mxu1 %v1318_v46 }
  0x8c   : > { %449 = vmatprep.mubr.bf16.mxu0 %v1646_v0  ;;  %1195 = vmatprep.subr.bf16.mxu1 %v1319_v47 }
  0x8f   : > { %1196 = vmatpush3.bf16.msra.mxu1 %v1319_v47 }
  0x90   : > { %1197 = vmatprep.subr.bf16.mxu1 %v1320_v48 }
  0x93   : > { %450 = vmatmul.mubr.bf16.gmra.mrb[4].mxu0 %v292_v22  ;;  %1198 = vmatpush3.bf16.msra.mxu1 %v1320_v48 }
  0x94   : > { %459 = vmatprep.mubr.bf16.mxu0 %v1646_v0 }
  0x9b   : > { %460 = vmatmul.mubr.bf16.gmra.mrb[8].mxu0 %v293_v25 }
  0x9c   : > { %469 = vmatprep.mubr.bf16.mxu0 %v1646_v0 }
  0xa3   : > { %470 = vmatmul.mubr.bf16.gmra.mrb[12].mxu0 %v294_v28 }
  0xa4   : > { %479 = vmatprep.mubr.bf16.mxu0 %v1646_v0 }
  0xab   : > { %480 = vmatmul.mubr.bf16.gmra.mrb[16].mxu0 %v295_v31 }
  0xac   : > { %489 = vmatprep.mubr.bf16.mxu0 %v1646_v0 }
  0xb3   : > { %490 = vmatmul.mubr.bf16.gmra.mrb[20].mxu0 %v296_v34 }
  0xb4   : > { %499 = vmatprep.mubr.bf16.mxu0 %v1646_v0 }
  0xbb   : > { %500 = vmatmul.mubr.bf16.gmra.mrb[24].mxu0 %v297_v37 }
  0xbc   : > { %509 = vmatprep.mubr.bf16.mxu0 %v1646_v0 }
  0xc3   : > { %510 = vmatmul.mubr.bf16.gmra.mrb[28].mxu0 %v298_v40 }
 0x15e   : > { %v441_v54 = vpop.f32.mrb[0].mxu0 }
 0x15f   : > { %v442_v55 = vadd.f32 %v441_v54, %v1955_v53  ;;  %v1958_v56 = vpop.f32.mrb[1].mxu0 }
 0x160   : > { %v445_v57 = vpop.f32.mrb[2].mxu0 }
 0x161   : > { %v1119_v58 = vmul.f32 -1.442695, %v442_v55  ;;  %v446_v59 = vadd.f32 %v445_v57, %v1955_v53  ;;  %v1961_v60 = vpop.f32.mrb[3].mxu0 }
 0x163   : > { %1321 = vpow2.f32 %v1119_v58  ;;  %v1120_v61 = vmul.f32 -1.442695, %v446_v59 }
 0x165   : > { %1323 = vpow2.f32 %v1120_v61 }
 0x166   : > { %v451_v62 = vpop.f32.mrb[4].mxu0 }
 0x167   : > { %v452_v63 = vadd.f32 %v451_v62, %v1955_v53  ;;  %v1964_v0 = vpop.f32.mrb[5].mxu0 }
 0x168   : > { %v455_v1 = vpop.f32.mrb[6].mxu0 }
 0x169   : > { %v1121_v2 = vmul.f32 -1.442695, %v452_v63  ;;  %v456_v3 = vadd.f32 %v455_v1, %v1955_v53  ;;  %v1967_v4 = vpop.f32.mrb[7].mxu0 }
 0x16b   : > { %1325 = vpow2.f32 %v1121_v2  ;;  %v1122_v5 = vmul.f32 -1.442695, %v456_v3 }
 0x16d   : > { %v1322_v6 = vpop.eup %1321  ;;  %1327 = vpow2.f32 %v1122_v5 }
 0x16e   : > { %v568_v7 = vadd.f32 1.0, %v1322_v6  ;;  %v461_v8 = vpop.f32.mrb[8].mxu0 }
 0x16f   : > { %v1324_v9 = vpop.eup %1323  ;;  %v462_v10 = vadd.f32 %v461_v8, %v1955_v53  ;;  %v1970_v11 = vpop.f32.mrb[9].mxu0 }
 0x170   : > { %1329 = vrcp.f32 %v568_v7  ;;  %v569_v12 = vadd.f32 1.0, %v1324_v9  ;;  %v465_v13 = vpop.f32.mrb[10].mxu0 }
 0x171   : > { %v1123_v14 = vmul.f32 -1.442695, %v462_v10  ;;  %v466_v15 = vadd.f32 %v465_v13, %v1955_v53  ;;  %v1973_v16 = vpop.f32.mrb[11].mxu0 }
 0x172   : > { %1331 = vrcp.f32 %v569_v12 }
 0x173   : > { %v1124_v19 = vmul.f32 -1.442695, %v466_v15  ;;  %1333 = vpow2.f32 %v1123_v14 }
 0x175   : > { %v1326_v22 = vpop.eup %1325  ;;  %1335 = vpow2.f32 %v1124_v19 }
 0x176   : > { %v570_v25 = vadd.f32 1.0, %v1326_v22  ;;  %v471_v28 = vpop.f32.mrb[12].mxu0 }
 0x177   : > { %v1328_v31 = vpop.eup %1327  ;;  %v472_v34 = vadd.f32 %v471_v28, %v1955_v53  ;;  %v1976_v37 = vpop.f32.mrb[13].mxu0 }
 0x178   : > { %1337 = vrcp.f32 %v570_v25  ;;  %v571_v40 = vadd.f32 1.0, %v1328_v31  ;;  %v475_v41 = vpop.f32.mrb[14].mxu0 }
 0x179   : > { %v1125_v42 = vmul.f32 -1.442695, %v472_v34  ;;  %v476_v43 = vadd.f32 %v475_v41, %v1955_v53  ;;  %v1979_v44 = vpop.f32.mrb[15].mxu0 }
 0x17a   : > { %v1330_v45 = vpop.eup %1329  ;;  %1339 = vrcp.f32 %v571_v40 }
 0x17b   : > { %v1126_v46 = vmul.f32 -1.442695, %v476_v43  ;;  %1341 = vpow2.f32 %v1125_v42  ;;  %v616_v48 = vmul.f32 %v1330_v45, %v1876_v17 }
 0x17c   : > { %v1332_v47 = vpop.eup %1331 }
 0x17d   : > { %v617_v49 = vmul.f32 %v1332_v47, %v1879_v18  ;;  %v1334_v51 = vpop.eup %1333  ;;  %1343 = vpow2.f32 %v1126_v46 }
 0x17e   : > { %v481_v54 = vpop.f32.mrb[16].mxu0  ;;  %v572_v55 = vadd.f32 1.0, %v1334_v51 }
 0x17f   : > { %v482_v57 = vadd.f32 %v481_v54, %v1955_v53  ;;  %v1984_v58 = vpop.f32.mrb[17].mxu0  ;;  %v632_v59 = vpack.c.bf16 %v617_v49, %v616_v48  ;;  %v1336_v61 = vpop.eup %1335 }
 0x180   : > { %v485_v62 = vpop.f32.mrb[18].mxu0  ;;  %1345 = vrcp.f32 %v572_v55  ;;  %v573_v63 = vadd.f32 1.0, %v1336_v61 }
 0x181   : > { %v1127_v1 = vmul.f32 -1.442695, %v482_v57  ;;  %v486_v2 = vadd.f32 %v485_v62, %v1955_v53  ;;  %v1987_v3 = vpop.f32.mrb[19].mxu0  ;;  %1199 = vmatprep.mubr.bf16.mxu1 %v632_v59 }
 0x182   : > { %v1338_v5 = vpop.eup %1337  ;;  %1347 = vrcp.f32 %v573_v63 }
 0x183   : > { %v1128_v6 = vmul.f32 -1.442695, %v486_v2  ;;  %1349 = vpow2.f32 %v1127_v1  ;;  %v618_v8 = vmul.f32 %v1338_v5, %v1885_v20 }
 0x184   : > { %v1340_v7 = vpop.eup %1339 }
 0x185   : > { %v619_v9 = vmul.f32 %v1340_v7, %v1888_v21  ;;  %v1342_v10 = vpop.eup %1341  ;;  %1351 = vpow2.f32 %v1128_v6 }
 0x186   : > { %v491_v12 = vpop.f32.mrb[20].mxu0  ;;  %v574_v13 = vadd.f32 1.0, %v1342_v10 }
 0x187   : > { %v492_v14 = vadd.f32 %v491_v12, %v1955_v53  ;;  %v1992_v15 = vpop.f32.mrb[21].mxu0  ;;  %v633_v19 = vpack.c.bf16 %v619_v9, %v618_v8  ;;  %v1344_v22 = vpop.eup %1343 }
 0x188   : > { %v495_v25 = vpop.f32.mrb[22].mxu0  ;;  %1353 = vrcp.f32 %v574_v13  ;;  %v575_v28 = vadd.f32 1.0, %v1344_v22 }
 0x189   : > { %v1129_v31 = vmul.f32 -1.442695, %v492_v14  ;;  %v496_v34 = vadd.f32 %v495_v25, %v1955_v53  ;;  %v1995_v40 = vpop.f32.mrb[23].mxu0  ;;  %1200 = vmatmul.mubr.bf16.vlgmr.msra.gmra.mrb[0].mxu1 %v633_v19 }
 0x18a   : > { %v1346_v41 = vpop.eup %1345  ;;  %1355 = vrcp.f32 %v575_v28 }
 0x18b   : > { %v1130_v42 = vmul.f32 -1.442695, %v496_v34  ;;  %1357 = vpow2.f32 %v1129_v31  ;;  %v620_v46 = vmul.f32 %v1346_v41, %v1894_v23 }
 0x18c   : > { %v1348_v43 = vpop.eup %1347 }
 0x18d   : > { %v621_v47 = vmul.f32 %v1348_v43, %v1897_v24  ;;  %v1350_v48 = vpop.eup %1349  ;;  %1359 = vpow2.f32 %v1130_v42 }
 0x18e   : > { %v501_v45 = vpop.f32.mrb[24].mxu0  ;;  %v576_v54 = vadd.f32 1.0, %v1350_v48 }
 0x18f   : > { %v502_v49 = vadd.f32 %v501_v45, %v1955_v53  ;;  %v2000_v51 = vpop.f32.mrb[25].mxu0  ;;  %v634_v57 = vpack.c.bf16 %v621_v47, %v620_v46  ;;  %v1352_v59 = vpop.eup %1351 }
 0x190   : > { %v505_v55 = vpop.f32.mrb[26].mxu0  ;;  %1361 = vrcp.f32 %v576_v54  ;;  %v577_v63 = vadd.f32 1.0, %v1352_v59 }
 0x191   : > { %v506_v61 = vadd.f32 %v505_v55, %v1955_v53  ;;  %v2003_v62 = vpop.f32.mrb[27].mxu0  ;;  %v1131_v1 = vmul.f32 -1.442695, %v502_v49  ;;  %1203 = vmatprep.mubr.bf16.mxu1 %v634_v57 }
 0x192   : > { %v1354_v2 = vpop.eup %1353  ;;  %1363 = vrcp.f32 %v577_v63 }
 0x193   : > { %v1132_v5 = vmul.f32 -1.442695, %v506_v61  ;;  %1365 = vpow2.f32 %v1131_v1  ;;  %v622_v8 = vmul.f32 %v1354_v2, %v1903_v26 }
 0x194   : > { %v1356_v6 = vpop.eup %1355 }
 0x195   : > { %v623_v9 = vmul.f32 %v1356_v6, %v1906_v27  ;;  %v1358_v10 = vpop.eup %1357  ;;  %1367 = vpow2.f32 %v1132_v5 }
 0x196   : > { %v511_v7 = vpop.f32.mrb[28].mxu0  ;;  %v578_v14 = vadd.f32 1.0, %v1358_v10 }
 0x197   : > { %v512_v12 = vadd.f32 %v511_v7, %v1955_v53  ;;  %v2008_v13 = vpop.f32.mrb[29].mxu0  ;;  %v635_v22 = vpack.c.bf16 %v623_v9, %v622_v8  ;;  %v1360_v25 = vpop.eup %1359 }
 0x198   : > { %v515_v19 = vpop.f32.mrb[30].mxu0  ;;  %1369 = vrcp.f32 %v578_v14  ;;  %v579_v34 = vadd.f32 1.0, %v1360_v25 }
 0x199   : > { %v516_v28 = vadd.f32 %v515_v19, %v1955_v53  ;;  %v2011_v31 = vpop.f32.mrb[31].mxu0  ;;  %v1133_v41 = vmul.f32 -1.442695, %v512_v12  ;;  %1204 = vmatmul.mubr.bf16.gmra.mrb[4].mxu1 %v635_v22 }
 0x19a   : > { %v1362_v42 = vpop.eup %1361  ;;  %1371 = vrcp.f32 %v579_v34 }
 0x19b   : > { %v1134_v43 = vmul.f32 -1.442695, %v516_v28  ;;  %1373 = vpow2.f32 %v1133_v41  ;;  %v624_v46 = vmul.f32 %v1362_v42, %v1912_v29  ;;  %v323_v41 = vsub.s32 1, %v1946_v50 }
 0x19c   : > { %v1364_v45 = vpop.eup %1363 }
 0x19d   : > { %v625_v47 = vmul.f32 %v1364_v45, %v1915_v30  ;;  %v1366_v48 = vpop.eup %1365  ;;  %1375 = vpow2.f32 %v1134_v43  ;;  %v2023_v42 = vrot.slane %v1952_v52, %v323_v41 }
 0x19e   : > { %v580_v49 = vadd.f32 1.0, %v1366_v48 }
 0x19f   : > { %v636_v54 = vpack.c.bf16 %v625_v47, %v624_v46  ;;  %v1368_v53 = vpop.eup %1367  ;;  %v444_v43 = vadd.f32 %v1958_v56, %v2023_v42  ;;  %v448_v45 = vadd.f32 %v1961_v60, %v2023_v42  ;;  %v454_v47 = vadd.f32 %v1964_v0, %v2023_v42 }
 0x1a0   : > { %1377 = vrcp.f32 %v580_v49  ;;  %v581_v55 = vadd.f32 1.0, %v1368_v53  ;;  %v458_v49 = vadd.f32 %v1967_v4, %v2023_v42  ;;  %v464_v56 = vadd.f32 %v1970_v11, %v2023_v42 }
 0x1a1   : > { %1207 = vmatprep.mubr.bf16.mxu1 %v636_v54  ;;  %v1144_v46 = vmul.f32 -1.442695, %v444_v43  ;;  %v1145_v48 = vmul.f32 -1.442695, %v448_v45  ;;  %v1146_v54 = vmul.f32 -1.442695, %v454_v47  ;;  %v468_v60 = vadd.f32 %v1973_v16, %v2023_v42 }
 0x1a2   : > { %v1370_v57 = vpop.eup %1369  ;;  %1379 = vrcp.f32 %v581_v55  ;;  %v1147_v50 = vmul.f32 -1.442695, %v458_v49  ;;  %v474_v4 = vadd.f32 %v1976_v37, %v2023_v42  ;;  %v494_v45 = vadd.f32 %v1992_v15, %v2023_v42 }
 0x1a3   : > { %v626_v61 = vmul.f32 %v1370_v57, %v1921_v32 }
 0x1a4   : > { %v1372_v59 = vpop.eup %1371  ;;  %v1150_v11 = vmul.f32 -1.442695, %v474_v4 }
 0x1a5   : > { %v627_v63 = vmul.f32 %v1372_v59, %v1924_v33  ;;  %v1374_v1 = vpop.eup %1373 }
 0x1a6   : > { %v582_v2 = vadd.f32 1.0, %v1374_v1  ;;  %v478_v1 = vadd.f32 %v1979_v44, %v2023_v42 }
 0x1a7   : > { %v637_v5 = vpack.c.bf16 %v627_v63, %v626_v61  ;;  %v1376_v6 = vpop.eup %1375  ;;  %v1148_v61 = vmul.f32 -1.442695, %v464_v56  ;;  %v1149_v63 = vmul.f32 -1.442695, %v468_v60 }
 0x1a8   : > { %1381 = vrcp.f32 %v582_v2  ;;  %v583_v7 = vadd.f32 1.0, %v1376_v6  ;;  %v1151_v16 = vmul.f32 -1.442695, %v478_v1  ;;  %v2044_v6 = vld [vmem:[%s2169_s4] ss:$0 sm:$0xff] }
 0x1a9   : > { %1208 = vmatmul.mubr.bf16.gmra.mrb[8].mxu1 %v637_v5 }
 0x1aa   : > { %v1378_v8 = vpop.eup %1377  ;;  %1383 = vrcp.f32 %v583_v7 }
 0x1ab   : > { %v628_v10 = vmul.f32 %v1378_v8, %v1930_v35  ;;  %1385 = vpow2.f32 %v1144_v46 }
 0x1ac   : > { %v1380_v9 = vpop.eup %1379  ;;  %1387 = vpow2.f32 %v1145_v48 }
 0x1ad   : > { %v629_v12 = vmul.f32 %v1380_v9, %v1933_v36  ;;  %1389 = vpow2.f32 %v1146_v54 }
 0x1ae   : > { %1391 = vpow2.f32 %v1147_v50 }
 0x1af   : > { %v638_v14 = vpack.c.bf16 %v629_v12, %v628_v10 }
 0x1b1   : > { %1211 = vmatprep.mubr.bf16.mxu1 %v638_v14  ;;  %v484_v14 = vadd.f32 %v1984_v58, %v2023_v42  ;;  %v498_v58 = vadd.f32 %v1995_v40, %v2023_v42 }
 0x1b2   : > { %v1382_v19 = vpop.eup %1381 }
 0x1b3   : > { %v630_v25 = vmul.f32 %v1382_v19, %v1939_v38  ;;  %v1152_v43 = vmul.f32 -1.442695, %v484_v14  ;;  %v1155_v56 = vmul.f32 -1.442695, %v498_v58 }
 0x1b4   : > { %v1384_v22 = vpop.eup %1383 }
 0x1b5   : > { %v631_v28 = vmul.f32 %v1384_v22, %v1942_v39  ;;  %v1386_v52 = vpop.eup %1385 }
 0x1b6   : > { %v1388_v53 = vpop.eup %1387  ;;  %v872_v55 = vadd.f32 1.0, %v1386_v52 }
 0x1b7   : > { %v639_v34 = vpack.c.bf16 %v631_v28, %v630_v25  ;;  %v1390_v0 = vpop.eup %1389  ;;  %v873_v57 = vadd.f32 1.0, %v1388_v53  ;;  %v488_v25 = vadd.f32 %v1987_v3, %v2023_v42  ;;  %v1154_v3 = vmul.f32 -1.442695, %v494_v45 }
 0x1b8   : > { %v1392_v59 = vpop.eup %1391  ;;  %1393 = vrcp.f32 %v872_v55  ;;  %v874_v2 = vadd.f32 1.0, %v1390_v0 }
 0x1b9   : > { %1212 = vmatmul.mubr.bf16.gmra.mrb[12].mxu1 %v639_v34  ;;  %1395 = vrcp.f32 %v873_v57  ;;  %v875_v5 = vadd.f32 1.0, %v1392_v59  ;;  %v1153_v47 = vmul.f32 -1.442695, %v488_v25  ;;  %v508_v25 = vadd.f32 %v2003_v62, %v2023_v42 }
 0x1ba   : > { %1397 = vpow2.f32 %v1148_v61 }
 0x1bb   : > { %1399 = vpow2.f32 %v1149_v63 }
 0x1bc   : > { %1401 = vrcp.f32 %v874_v2 }
 0x1bd   : > { %1403 = vrcp.f32 %v875_v5 }
 0x1be   : > { %1405 = vpow2.f32 %v1150_v11 }
 0x1bf   : > { %1407 = vpow2.f32 %v1151_v16 }
 0x1c2   : > { %v1394_v22 = vpop.eup %1393 }
 0x1c3   : > { %v1396_v28 = vpop.eup %1395  ;;  %v920_v59 = vsub.f32 1.0, %v1394_v22 }
 0x1c4   : > { %v1398_v34 = vpop.eup %1397  ;;  %v921_v5 = vsub.f32 1.0, %v1396_v28 }
 0x1c5   : > { %v1400_v41 = vpop.eup %1399  ;;  %v876_v49 = vadd.f32 1.0, %v1398_v34 }
 0x1c6   : > { %v1402_v46 = vpop.eup %1401  ;;  %v877_v50 = vadd.f32 1.0, %v1400_v41 }
 0x1c7   : > { %v1404_v48 = vpop.eup %1403  ;;  %v922_v55 = vsub.f32 1.0, %v1402_v46 }
 0x1c8   : > { %v1406_v54 = vpop.eup %1405  ;;  %v923_v63 = vsub.f32 1.0, %v1404_v48  ;;  %v1157_v48 = vmul.f32 -1.442695, %v508_v25 }
 0x1c9   : > { %v1408_v52 = vpop.eup %1407  ;;  %v878_v0 = vadd.f32 1.0, %v1406_v54 }
 0x1ca   : > { %v879_v40 = vadd.f32 1.0, %v1408_v52 }
 0x25c   : > { %v1201_v37 = vpop.f32.mrb[0].mxu1 }
 0x25d   : > { %v754_v7 = vadd.f32 %v1201_v37, %v2044_v6  ;;  %v745_v44 = vpop.f32.mrb[1].mxu1 }
 0x25e   : > { %v746_v8 = vadd.f32 %v2044_v6, %v745_v44  ;;  %v1202_v9 = vpop.f32.mrb[2].mxu1 }
 0x25f   : > { %1409 = vtanh.f32 %v754_v7  ;;  %v757_v10 = vadd.f32 %v1202_v9, %v2044_v6  ;;  %v748_v12 = vpop.f32.mrb[3].mxu1 }
 0x260   : > { %1411 = vtanh.f32 %v746_v8  ;;  %v749_v19 = vadd.f32 %v2044_v6, %v748_v12 }
 0x261   : > { %1413 = vtanh.f32 %v757_v10 }
 0x262   : > { %1415 = vtanh.f32 %v749_v19  ;;  %v504_v19 = vadd.f32 %v2000_v51, %v2023_v42 }
 0x263   : > { %1417 = vpow2.f32 %v1152_v43 }
 0x264   : > { %1419 = vpow2.f32 %v1153_v47  ;;  %v1156_v46 = vmul.f32 -1.442695, %v504_v19  ;;  %v514_v47 = vadd.f32 %v2008_v13, %v2023_v42 }
 0x265   : > { %1421 = vrcp.f32 %v876_v49  ;;  %v518_v49 = vadd.f32 %v2011_v31, %v2023_v42 }
 0x266   : > { %1423 = vrcp.f32 %v877_v50 }
 0x267   : > { %1425 = vpow2.f32 %v1154_v3 }
 0x268   : > { %1427 = vpow2.f32 %v1155_v56 }
 0x269   : > { %v1410_v53 = vpop.eup %1409  ;;  %1429 = vrcp.f32 %v878_v0 }
 0x26a   : > { %v1412_v60 = vpop.eup %1411  ;;  %v938_v15 = vsub.f32 %v1410_v53, %v1885_v20  ;;  %1431 = vrcp.f32 %v879_v40  ;;  %v1158_v53 = vmul.f32 -1.442695, %v514_v47 }
 0x26b   : > { %v1414_v57 = vpop.eup %1413  ;;  %v936_v61 = vsub.f32 %v1412_v60, %v1876_v17 }
 0x26c   : > { %v1416_v4 = vpop.eup %1415  ;;  %v954_v1 = vmul.f32 %v938_v15, %v922_v55  ;;  %v939_v2 = vsub.f32 %v1414_v57, %v1888_v21  ;;  %v1205_v37 = vpop.f32.mrb[4].mxu1  ;;  %v1159_v55 = vmul.f32 -1.442695, %v518_v49 }
 0x26d   : > { %v952_v11 = vmul.f32 %v936_v61, %v920_v59  ;;  %v937_v16 = vsub.f32 %v1416_v4, %v1879_v18  ;;  %v770_v20 = vadd.f32 %v1205_v37, %v2044_v6  ;;  %v761_v7 = vpop.f32.mrb[5].mxu1  ;;  %v1418_v12 = vpop.eup %1417 }
 0x26e   : > { %970 = vst [vmem:[%s2064_s28 + $0x10] sm:$0xff] %v954_v1  ;;  %v955_v17 = vmul.f32 %v939_v2, %v923_v63  ;;  %v762_v44 = vadd.f32 %v2044_v6, %v761_v7  ;;  %v1206_v18 = vpop.f32.mrb[6].mxu1  ;;  %v1420_v14 = vpop.eup %1419  ;;  %v880_v34 = vadd.f32 1.0, %v1418_v12 }
 0x26f   : > { %968 = vst [vmem:[%s2064_s28] sm:$0xff] %v952_v11  ;;  %v953_v21 = vmul.f32 %v937_v16, %v921_v5  ;;  %1433 = vtanh.f32 %v770_v20  ;;  %v773_v8 = vadd.f32 %v1206_v18, %v2044_v6  ;;  %v764_v9 = vpop.f32.mrb[7].mxu1  ;;  %v1422_v22 = vpop.eup %1421  ;;  %v881_v43 = vadd.f32 1.0, %v1420_v14 }
 0x270   : > { %971 = vst [vmem:[%s2064_s28 + $0x18] sm:$0xff] %v955_v17  ;;  %1435 = vtanh.f32 %v762_v44  ;;  %v765_v10 = vadd.f32 %v2044_v6, %v764_v9  ;;  %v1424_v28 = vpop.eup %1423  ;;  %v924_v13 = vsub.f32 1.0, %v1422_v22 }
 0x271   : > { %969 = vst [vmem:[%s2064_s28 + $0x8] sm:$0xff] %v953_v21  ;;  %1437 = vtanh.f32 %v773_v8  ;;  %v1426_v41 = vpop.eup %1425  ;;  %v925_v59 = vsub.f32 1.0, %v1424_v28 }
 0x272   : > { %1439 = vtanh.f32 %v765_v10  ;;  %v1428_v45 = vpop.eup %1427  ;;  %v882_v54 = vadd.f32 1.0, %v1426_v41 }
 0x273   : > { %v1430_v58 = vpop.eup %1429  ;;  %1441 = vrcp.f32 %v880_v34  ;;  %v883_v62 = vadd.f32 1.0, %v1428_v45 }
 0x274   : > { %v1432_v51 = vpop.eup %1431  ;;  %1443 = vrcp.f32 %v881_v43  ;;  %v926_v3 = vsub.f32 1.0, %v1430_v58 }
 0x275   : > { %1445 = vpow2.f32 %v1156_v46  ;;  %v927_v42 = vsub.f32 1.0, %v1432_v51 }
 0x276   : > { %1447 = vpow2.f32 %v1157_v48 }
 0x277   : > { %1449 = vrcp.f32 %v882_v54 }
 0x278   : > { %1451 = vrcp.f32 %v883_v62 }
 0x279   : > { %v1434_v50 = vpop.eup %1433  ;;  %1453 = vpow2.f32 %v1158_v53 }
 0x27a   : > { %v1436_v52 = vpop.eup %1435  ;;  %v942_v56 = vsub.f32 %v1434_v50, %v1903_v26  ;;  %1455 = vpow2.f32 %v1159_v55 }
 0x27b   : > { %v1438_v60 = vpop.eup %1437  ;;  %v940_v0 = vsub.f32 %v1436_v52, %v1894_v23 }
 0x27c   : > { %v1440_v31 = vpop.eup %1439  ;;  %v958_v15 = vmul.f32 %v942_v56, %v926_v3  ;;  %v943_v57 = vsub.f32 %v1438_v60, %v1906_v27  ;;  %v1209_v61 = vpop.f32.mrb[8].mxu1 }
 0x27d   : > { %v956_v40 = vmul.f32 %v940_v0, %v924_v13  ;;  %v941_v26 = vsub.f32 %v1440_v31, %v1897_v24  ;;  %v786_v23 = vadd.f32 %v1209_v61, %v2044_v6  ;;  %v777_v63 = vpop.f32.mrb[9].mxu1  ;;  %v1442_v16 = vpop.eup %1441 }
 0x27e   : > { %974 = vst [vmem:[%s2064_s28 + $0x30] sm:$0xff] %v958_v15  ;;  %v959_v4 = vmul.f32 %v943_v57, %v927_v42  ;;  %v778_v2 = vadd.f32 %v2044_v6, %v777_v63  ;;  %v1210_v27 = vpop.f32.mrb[10].mxu1  ;;  %v1444_v37 = vpop.eup %1443  ;;  %v928_v28 = vsub.f32 1.0, %v1442_v16 }
 0x27f   : > { %972 = vst [vmem:[%s2064_s28 + $0x20] sm:$0xff] %v956_v40  ;;  %v957_v1 = vmul.f32 %v941_v26, %v925_v59  ;;  %1457 = vtanh.f32 %v786_v23  ;;  %v789_v5 = vadd.f32 %v1210_v27, %v2044_v6  ;;  %v780_v11 = vpop.f32.mrb[11].mxu1  ;;  %v1446_v17 = vpop.eup %1445  ;;  %v929_v58 = vsub.f32 1.0, %v1444_v37 }
 0x280   : > { %975 = vst [vmem:[%s2064_s28 + $0x38] sm:$0xff] %v959_v4  ;;  %1459 = vtanh.f32 %v778_v2  ;;  %v781_v24 = vadd.f32 %v2044_v6, %v780_v11  ;;  %v1448_v20 = vpop.eup %1447  ;;  %v884_v8 = vadd.f32 1.0, %v1446_v17 }
 0x281   : > { %973 = vst [vmem:[%s2064_s28 + $0x28] sm:$0xff] %v957_v1  ;;  %1461 = vtanh.f32 %v789_v5  ;;  %v1450_v7 = vpop.eup %1449  ;;  %v885_v10 = vadd.f32 1.0, %v1448_v20 }
 0x282   : > { %1463 = vtanh.f32 %v781_v24  ;;  %v1452_v21 = vpop.eup %1451  ;;  %v930_v14 = vsub.f32 1.0, %v1450_v7 }
 0x283   : > { %v1454_v44 = vpop.eup %1453  ;;  %v931_v45 = vsub.f32 1.0, %v1452_v21  ;;  %1465 = vrcp.f32 %v884_v8 }
 0x284   : > { %v1456_v18 = vpop.eup %1455  ;;  %v886_v19 = vadd.f32 1.0, %v1454_v44  ;;  %1467 = vrcp.f32 %v885_v10 }
 0x285   : > { %v887_v34 = vadd.f32 1.0, %v1456_v18 }
 0x286   : > { %1469 = vrcp.f32 %v886_v19 }
 0x287   : > { %1471 = vrcp.f32 %v887_v34 }
 0x289   : > { %v1458_v9 = vpop.eup %1457 }
 0x28a   : > { %v1460_v12 = vpop.eup %1459  ;;  %v946_v22 = vsub.f32 %v1458_v9, %v1921_v32 }
 0x28b   : > { %v1462_v25 = vpop.eup %1461  ;;  %v944_v41 = vsub.f32 %v1460_v12, %v1912_v29 }
 0x28c   : > { %v1464_v43 = vpop.eup %1463  ;;  %v962_v46 = vmul.f32 %v946_v22, %v930_v14  ;;  %v947_v47 = vsub.f32 %v1462_v25, %v1924_v33  ;;  %v1213_v32 = vpop.f32.mrb[12].mxu1 }
 0x28d   : > { %v960_v48 = vmul.f32 %v944_v41, %v928_v28  ;;  %v945_v49 = vsub.f32 %v1464_v43, %v1915_v30  ;;  %v802_v29 = vadd.f32 %v1213_v32, %v2044_v6  ;;  %v793_v54 = vpop.f32.mrb[13].mxu1  ;;  %v1466_v53 = vpop.eup %1465 }
 0x28e   : > { %978 = vst [vmem:[%s2064_s28 + $0x50] sm:$0xff] %v962_v46  ;;  %v963_v51 = vmul.f32 %v947_v47, %v931_v45  ;;  %v794_v62 = vadd.f32 %v2044_v6, %v793_v54  ;;  %v1214_v33 = vpop.f32.mrb[14].mxu1  ;;  %v1468_v56 = vpop.eup %1467  ;;  %v932_v57 = vsub.f32 1.0, %v1466_v53 }
 0x28f   : > { %976 = vst [vmem:[%s2064_s28 + $0x40] sm:$0xff] %v960_v48  ;;  %v961_v50 = vmul.f32 %v945_v49, %v929_v58  ;;  %1473 = vtanh.f32 %v802_v29  ;;  %v805_v52 = vadd.f32 %v1214_v33, %v2044_v6  ;;  %v796_v3 = vpop.f32.mrb[15].mxu1  ;;  %v933_v4 = vsub.f32 1.0, %v1468_v56 }
 0x290   : > { %979 = vst [vmem:[%s2064_s28 + $0x58] sm:$0xff] %v963_v51  ;;  %1475 = vtanh.f32 %v794_v62  ;;  %v797_v30 = vadd.f32 %v2044_v6, %v796_v3  ;;  %v1470_v60 = vpop.eup %1469 }
 0x291   : > { %977 = vst [vmem:[%s2064_s28 + $0x48] sm:$0xff] %v961_v50  ;;  %1477 = vtanh.f32 %v805_v52  ;;  %v1472_v13 = vpop.eup %1471  ;;  %v934_v31 = vsub.f32 1.0, %v1470_v60 }
 0x292   : > { %1479 = vtanh.f32 %v797_v30  ;;  %v935_v40 = vsub.f32 1.0, %v1472_v13 }
 0x299   : > { %v1474_v55 = vpop.eup %1473 }
 0x29a   : > { %v1476_v0 = vpop.eup %1475  ;;  %v950_v42 = vsub.f32 %v1474_v55, %v1939_v38 }
 0x29b   : > { %v1478_v15 = vpop.eup %1477  ;;  %v948_v59 = vsub.f32 %v1476_v0, %v1930_v35 }
 0x29c   : > { %v1480_v6 = vpop.eup %1479  ;;  %v966_v26 = vmul.f32 %v950_v42, %v934_v31  ;;  %v951_v61 = vsub.f32 %v1478_v15, %v1942_v39 }
 0x29d   : > { %v964_v23 = vmul.f32 %v948_v59, %v932_v57  ;;  %v949_v38 = vsub.f32 %v1480_v6, %v1933_v36 }
 0x29e   : > { %982 = vst [vmem:[%s2064_s28 + $0x70] sm:$0xff] %v966_v26  ;;  %v967_v63 = vmul.f32 %v951_v61, %v935_v40 }
 0x29f   : > { %980 = vst [vmem:[%s2064_s28 + $0x60] sm:$0xff] %v964_v23  ;;  %v965_v35 = vmul.f32 %v949_v38, %v933_v4 }
 0x2a0   : > { %983 = vst [vmem:[%s2064_s28 + $0x78] sm:$0xff] %v967_v63 }
 0x2a1   : > { %981 = vst [vmem:[%s2064_s28 + $0x68] sm:$0xff] %v965_v35 }
 0x2a2   : > { %1580 = shalt.err (!%p1577_p1)
}
 0x2a3   : > { %s1581_s14 = scalar_lea.hbm %s2116_s12, 2048  ;;  %s1585_s15 = scalar_lea.hbm %s2170_s5, 4096 }
 0x2a4   : > { %p1582_p13 = scmp.ne.s32.totalorder %s2116_s12, %s1581_s14  ;;  %p1586_p4 = scmp.lt.u32.totalorder %s2116_s12, %s2170_s5 }
 0x2a5   : > { %p1587_p7 = scmp.lt.u32.totalorder %s1585_s15, %s1581_s14  ;;  %p1589_p11 = scmp.lt.u32.totalorder %s1581_s14, %s2116_s12 }
 0x2a6   : > { %p1583_p6 = pnand %p1582_p13, %p2184_p0 }
 0x2a7   : > { %p1588_p8 = por %p1587_p7, %p1586_p4 }
 0x2a8   : > { %p1584_p10 = pneg %p1583_p6 }
 0x2a9   : > { %p1590_p2 = por %p1589_p11, %p1588_p8 }
 0x2ab   : > { %p1591_p3 = pnand %p1590_p2, %p1584_p10 }
 0x2ad   : > { %1594 = shalt.err (!%p1591_p3)
}
 0x2ae   : > { %s1648_s13 = smov 128   ;;  %s1649_s11 = smov 8  }
 0x2af   : > { %1225 = dma.vmem_to_hbm [thread:$0]  (%p2184_p0), %s2118_s17, 2048, %s2116_s12, %s985_s22, %s1648_s13, %s1648_s13, %s1649_s11  }
 0x2b0 PF: > { %s1013_s29 = sand.u32 1, %s1625_s18   ;;  %p2185_p5 = scmp.ne.s32.totalorder %s2175_s25, 0 }
 0x2b1   : > { %p2186_p9 = scmp.ge.s32.totalorder %s1637_s21, 2  ;;  %s1014_s30 = scalar_lea.sflag [#allocation4], %s1013_s29 }
 0x2b3   : > { %p1239_p12 = pnand %p2186_p9, %p2185_p5 }
 0x2b5   : > { %1620 = dma.done.wait (!%p1239_p12), %s1014_s30, 2048  }
 0x2b6   : > { %1622 = vsyncadd (!%p1239_p12), %s1014_s30, 4294965248  ;;  %p19_p1 = scmp.ge.s32.totalorder %s1793_s23, 4   ;;  %s2187_s18 = smov %s1629_s19 }
 0x2b7   : > { %s2188_s19 = smov %s1633_s20  ;;  %s2189_s20 = smov %s1802_s7 }
 0x2b8   : > { %s2190_s21 = smov %s1793_s23  ;;  %21 = sbr.rel (!%p19_p1) target bundleno = 6 (0x6), region = 93 }
 0x2bf   :  { %1019 = vsyncpa [#allocation3], 1 }
 0x2c0   :  { %1021 = vsyncpa [#allocation3 + $0x1], 1 }
 0x2c1   :  { %1022 = vsyncpa [#allocation6], 1 }
 0x2c2   :  { %1023 = vsyncpa [#allocation4], 1 }
 0x2c3   :  { %1025 = vsyncpa [#allocation4 + $0x1], 1 }

</bundles_post_ra>
